<compile_context>
chip_gen: v6e
topology: v6e:2x2x1
jax: 0.10.0
libtpu: 0.0.40
codegen_flags: <defaults>
</compile_context>

<pallas_src>
import functools

import jax
import jax.numpy as jnp
from jax import lax
from jax.experimental import pallas as pl
from jax.experimental.pallas import tpu as pltpu


# --------------------------------------------------------------------------------------
# Pallas kernel
# --------------------------------------------------------------------------------------
def _multibox_kernel(boxes_ref, labels_ref, valid_ref, pxy_ref, pcxcy_ref,
                     locs_ref, scores_ref, out_ref, row_ref, col_ref,
                     *, threshold, neg_pos_ratio, rank_chunk):
    f32 = jnp.float32
    M = boxes_ref.shape[1]          # max objects per image
    P = pxy_ref.shape[1]            # number of priors
    C = scores_ref.shape[1]         # number of classes
    TK = rank_chunk

    boxes = boxes_ref[0]            # (M, 4)  ground-truth boxes, xy format
    labels = labels_ref[0]          # (M, 1)  labels as float (>=1 for real objects)
    valid = valid_ref[0]            # (M, 1)  1.0 for real objects, 0.0 for padding

    bx1 = boxes[:, 0:1]; by1 = boxes[:, 1:2]
    bx2 = boxes[:, 2:3]; by2 = boxes[:, 3:4]                           # (M, 1)
    px1 = pxy_ref[0:1, :]; py1 = pxy_ref[1:2, :]
    px2 = pxy_ref[2:3, :]; py2 = pxy_ref[3:4, :]                       # (1, P)

    # ---- Jaccard overlap between every (object, prior) pair: (M, P) --------------
    iw = jnp.maximum(jnp.minimum(bx2, px2) - jnp.maximum(bx1, px1), 0.0)
    ih = jnp.maximum(jnp.minimum(by2, py2) - jnp.maximum(by1, py1), 0.0)
    inter = iw * ih
    area_b = (bx2 - bx1) * (by2 - by1)                                 # (M, 1)
    area_p = (px2 - px1) * (py2 - py1)                                 # (1, P)
    iou = inter / (area_b + area_p - inter)                            # (M, P)
    iou = jnp.where(valid > 0.5, iou, -1.0)                            # mask padding

    obj_iota = lax.broadcasted_iota(jnp.int32, (M, 1), 0).astype(f32)  # 0..M-1
    prior_iota = lax.broadcasted_iota(jnp.int32, (1, P), 1).astype(f32)  # 0..P-1

    # Best object for each prior (first index on ties, like torch.max / argmax).
    ov_best = jnp.max(iou, axis=0, keepdims=True)                      # (1, P)
    obj_best = jnp.min(jnp.where(iou == ov_best, obj_iota, float(M)),
                       axis=0, keepdims=True)                          # (1, P)

    # Best prior for each object.
    ov_best_obj = jnp.max(iou, axis=1, keepdims=True)                  # (M, 1)
    prior_best = jnp.min(jnp.where(iou == ov_best_obj, prior_iota, float(P)),
                         axis=1, keepdims=True)                        # (M, 1)

    # Scatter override: each (valid) object claims its best prior with overlap 1.0;
    # for duplicate claims the highest object index wins (PyTorch last-write-wins).
    match = jnp.where(prior_iota == prior_best, valid, 0.0)            # (M, P)
    forced = jnp.max(match, axis=0, keepdims=True)                     # (1, P)
    forced_obj = jnp.max(jnp.where(match > 0.5, obj_iota, -1.0),
                         axis=0, keepdims=True)                        # (1, P)
    obj_for_prior = jnp.where(forced > 0.5, forced_obj, obj_best)      # (1, P)
    ov_for_prior = jnp.where(forced > 0.5, 1.0, ov_best)               # (1, P)

    # ---- Gather per-prior label / box via one-hot reduction over the M objects ---
    onehot_obj = (obj_iota == obj_for_prior).astype(f32)               # (M, P)
    label_for_prior = jnp.sum(onehot_obj * labels, axis=0, keepdims=True)
    label_for_prior = jnp.where(ov_for_prior < threshold, 0.0, label_for_prior)
    pos = (label_for_prior > 0.5).astype(f32)                          # (1, P)

    gx1 = jnp.sum(onehot_obj * bx1, axis=0, keepdims=True)
    gy1 = jnp.sum(onehot_obj * by1, axis=0, keepdims=True)
    gx2 = jnp.sum(onehot_obj * bx2, axis=0, keepdims=True)
    gy2 = jnp.sum(onehot_obj * by2, axis=0, keepdims=True)             # (1, P)
    gcx = (gx1 + gx2) * 0.5
    gcy = (gy1 + gy2) * 0.5
    gw = gx2 - gx1
    gh = gy2 - gy1

    # ---- gcxgcy encoding against the priors + localization L1 sum ----------------
    pcx = pcxcy_ref[0:1, :]; pcy = pcxcy_ref[1:2, :]
    pw = pcxcy_ref[2:3, :]; ph = pcxcy_ref[3:4, :]                     # (1, P)
    t_cx = (gcx - pcx) / (pw * 0.1)
    t_cy = (gcy - pcy) / (ph * 0.1)
    t_w = jnp.log(gw / pw) * 5.0
    t_h = jnp.log(gh / ph) * 5.0

    locs = locs_ref[0]                                                 # (4, P)
    loc_abs = (jnp.abs(locs[0:1, :] - t_cx) + jnp.abs(locs[1:2, :] - t_cy)
               + jnp.abs(locs[2:3, :] - t_w) + jnp.abs(locs[3:4, :] - t_h))
    loc_sum = jnp.sum(jnp.where(pos > 0.5, loc_abs, 0.0),
                      axis=1, keepdims=True)                           # (1, 1)

    # ---- Per-prior cross entropy (classes on sublanes, priors on lanes) ----------
    scores = scores_ref[0]                                             # (C, P)
    smax = jnp.max(scores, axis=0, keepdims=True)
    lse = smax + jnp.log(jnp.sum(jnp.exp(scores - smax), axis=0, keepdims=True))
    cls_iota = lax.broadcasted_iota(jnp.int32, (C, 1), 0).astype(f32)  # (C, 1)
    score_true = jnp.sum(jnp.where(cls_iota == label_for_prior, scores, 0.0),
                         axis=0, keepdims=True)                        # (1, P)
    ce = lse - score_true                                              # (1, P)

    n_pos = jnp.sum(pos, axis=1, keepdims=True)                        # (1, 1)
    ce_pos_sum = jnp.sum(jnp.where(pos > 0.5, ce, 0.0), axis=1, keepdims=True)
    ce_neg = jnp.where(pos > 0.5, 0.0, ce)                             # (1, P)

    # ---- Hard-negative mining: sum of the top-k negative CE, k = ratio * n_pos ---
    # Rank-based top-k (count of strictly-greater values < k) gives the same sum as
    # the PyTorch sort unless distinct priors have bit-identical CE at the boundary.
    k = neg_pos_ratio * n_pos                                          # (1, 1)
    row_ref[...] = ce_neg
    n_chunks = P // TK
    eye = (lax.broadcasted_iota(jnp.int32, (TK, TK), 0)
           == lax.broadcasted_iota(jnp.int32, (TK, TK), 1)).astype(f32)
    for c in range(n_chunks):  # static fill of the column-layout copy of ce_neg
        chunk = ce_neg[:, c * TK:(c + 1) * TK]                         # (1, TK)
        col_ref[c * TK:(c + 1) * TK, :] = jnp.sum(eye * chunk, axis=1, keepdims=True)

    def rank_body(c, acc):
        start = pl.multiple_of(c * TK, TK)
        col_chunk = col_ref[pl.ds(start, TK), :]                       # (TK, 1)
        rank = jnp.sum((row_ref[...] > col_chunk).astype(f32),
                       axis=1, keepdims=True)                          # (TK, 1)
        sel = (rank < k).astype(f32)
        return acc + jnp.sum(col_chunk * sel, axis=0, keepdims=True)

    hneg_sum = lax.fori_loop(0, n_chunks, rank_body, jnp.zeros((1, 1), f32))

    # ---- Per-image partial sums -> (1, 1, 4) output block -------------------------
    out_ref[0, :, 0:1] = n_pos
    out_ref[0, :, 1:2] = loc_sum
    out_ref[0, :, 2:3] = ce_pos_sum
    out_ref[0, :, 3:4] = hneg_sum


# --------------------------------------------------------------------------------------
# Wrapper
# --------------------------------------------------------------------------------------
def multibox_loss(predicted_locs, predicted_scores, boxes_padded, labels_padded,
                  n_objects, priors_cxcy, *, threshold=0.5, neg_pos_ratio=3,
                  alpha=1.0, rank_chunk=128):
    """Pallas-backed MultiBoxLoss forward.

    predicted_locs:   (N, P, 4) float32
    predicted_scores: (N, P, C) float32
    boxes_padded:     (N, M, 4) float32, xy format, padded to M objects
    labels_padded:    (N, M)    int,     padded (padding ignored via n_objects)
    n_objects:        (N,)      int,     number of real objects per image (>= 1)
    priors_cxcy:      (P, 4)    float32, priors in cxcy format
    """
    f32 = jnp.float32
    N, P, _ = predicted_locs.shape
    C = predicted_scores.shape[2]
    M = boxes_padded.shape[1]
    assert P % rank_chunk == 0, "P must be a multiple of rank_chunk"
    # TODO(synk): pad the prior dimension to a multiple of 128 for arbitrary P.

    priors_cxcy = priors_cxcy.astype(f32)
    priors_xy = jnp.concatenate([priors_cxcy[:, :2] - priors_cxcy[:, 2:] / 2.0,
                                 priors_cxcy[:, :2] + priors_cxcy[:, 2:] / 2.0], axis=1)

    # Lane-dense layout plumbing (priors on the lane axis inside the kernel).
    pxy_t = priors_xy.T                                                 # (4, P)
    pcxcy_t = priors_cxcy.T                                             # (4, P)
    locs_t = jnp.transpose(predicted_locs.astype(f32), (0, 2, 1))       # (N, 4, P)
    scores_t = jnp.transpose(predicted_scores.astype(f32), (0, 2, 1))   # (N, C, P)
    labels_col = labels_padded.astype(f32).reshape(N, M, 1)
    valid = (jnp.arange(M)[None, :] < n_objects[:, None]).astype(f32).reshape(N, M, 1)
    boxes_padded = boxes_padded.astype(f32)

    kernel = functools.partial(_multibox_kernel,
                               threshold=float(threshold),
                               neg_pos_ratio=float(neg_pos_ratio),
                               rank_chunk=int(rank_chunk))

    grid_spec = pltpu.PrefetchScalarGridSpec(
        num_scalar_prefetch=0,
        grid=(N,),
        in_specs=[
            pl.BlockSpec((1, M, 4), lambda n: (n, 0, 0)),   # boxes (xy)
            pl.BlockSpec((1, M, 1), lambda n: (n, 0, 0)),   # labels
            pl.BlockSpec((1, M, 1), lambda n: (n, 0, 0)),   # valid-object mask
            pl.BlockSpec((4, P), lambda n: (0, 0)),         # priors xy (transposed)
            pl.BlockSpec((4, P), lambda n: (0, 0)),         # priors cxcy (transposed)
            pl.BlockSpec((1, 4, P), lambda n: (n, 0, 0)),   # predicted locs (transposed)
            pl.BlockSpec((1, C, P), lambda n: (n, 0, 0)),   # predicted scores (transposed)
        ],
        out_specs=pl.BlockSpec((1, 1, 4), lambda n: (n, 0, 0)),
        scratch_shapes=[pltpu.VMEM((1, P), f32),            # ce_neg, row layout
                        pltpu.VMEM((P, 1), f32)],           # ce_neg, column layout
    )

    stats = pl.pallas_call(
        kernel,
        out_shape=jax.ShapeDtypeStruct((N, 1, 4), f32),
        grid_spec=grid_spec,
        compiler_params=pltpu.CompilerParams(
            dimension_semantics=("parallel",),
            vmem_limit_bytes=32 * 1024 * 1024),
    )(boxes_padded, labels_col, valid, pxy_t, pcxcy_t, locs_t, scores_t)

    stats = stats.reshape(N, 4)
    n_pos_tot = jnp.sum(stats[:, 0])
    loc_loss = jnp.sum(stats[:, 1]) / (4.0 * n_pos_tot)          # nn.L1Loss(mean)
    conf_loss = (jnp.sum(stats[:, 2]) + jnp.sum(stats[:, 3])) / n_pos_tot
    return conf_loss + alpha * loc_loss


# --------------------------------------------------------------------------------------
# Pure-JAX reference (mirrors the PyTorch module, for validation)
# --------------------------------------------------------------------------------------
def _cxcy_to_xy(c):
    return jnp.concatenate([c[:, :2] - c[:, 2:] / 2.0, c[:, :2] + c[:, 2:] / 2.0], axis=1)


def _xy_to_cxcy(xy):
    return jnp.concatenate([(xy[:, :2] + xy[:, 2:]) / 2.0, xy[:, 2:] - xy[:, :2]], axis=1)


def _cxcy_to_gcxgcy(cxcy, priors_cxcy):
    return jnp.concatenate(
        [(cxcy[:, :2] - priors_cxcy[:, :2]) / (priors_cxcy[:, 2:] / 10.0),
         jnp.log(cxcy[:, 2:] / priors_cxcy[:, 2:]) * 5.0], axis=1)


def _find_jaccard_overlap(a, b):
    lt = jnp.maximum(a[:, None, :2], b[None, :, :2])
    rb = jnp.minimum(a[:, None, 2:], b[None, :, 2:])
    wh = jnp.maximum(rb - lt, 0.0)
    inter = wh[..., 0] * wh[..., 1]
    area_a = (a[:, 2] - a[:, 0]) * (a[:, 3] - a[:, 1])
    area_b = (b[:, 2] - b[:, 0]) * (b[:, 3] - b[:, 1])
    return inter / (area_a[:, None] + area_b[None, :] - inter)


def multibox_loss_ref(predicted_locs, predicted_scores, boxes_list, labels_list,
                      priors_cxcy, threshold=0.5, neg_pos_ratio=3, alpha=1.0):
    priors_xy = _cxcy_to_xy(priors_cxcy)
    N, P, _ = predicted_locs.shape
    n_classes = predicted_scores.shape[2]
    true_locs = jnp.zeros((N, P, 4), jnp.float32)
    true_classes = jnp.zeros((N, P), jnp.int32)
    for i in range(N):
        b = boxes_list[i]
        lab = labels_list[i].astype(jnp.int32)
        n_obj = b.shape[0]
        overlap = _find_jaccard_overlap(b, priors_xy)            # (n_obj, P)
        ov_for_prior = jnp.max(overlap, axis=0)
        obj_for_prior = jnp.argmax(overlap, axis=0)
        prior_for_obj = jnp.argmax(overlap, axis=1)
        for j in range(n_obj):                                   # last-write-wins scatter
            obj_for_prior = obj_for_prior.at[prior_for_obj[j]].set(j)
            ov_for_prior = ov_for_prior.at[prior_for_obj[j]].set(1.0)
        lab_for_prior = lab[obj_for_prior]
        lab_for_prior = jnp.where(ov_for_prior < threshold, 0, lab_for_prior)
        true_classes = true_classes.at[i].set(lab_for_prior)
        true_locs = true_locs.at[i].set(
            _cxcy_to_gcxgcy(_xy_to_cxcy(b[obj_for_prior]), priors_cxcy))

    pos = true_classes != 0
    n_pos_tot = jnp.sum(pos).astype(jnp.float32)
    loc_loss = jnp.sum(jnp.where(pos[..., None],
                                 jnp.abs(predicted_locs - true_locs), 0.0)) / (4.0 * n_pos_tot)

    logits = predicted_scores.reshape(-1, n_classes)
    lse = jax.scipy.special.logsumexp(logits, axis=1)
    ce = (lse - jnp.take_along_axis(logits, true_classes.reshape(-1, 1), axis=1)[:, 0])
    ce = ce.reshape(N, P)
    ce_pos_sum = jnp.sum(jnp.where(pos, ce, 0.0))
    ce_neg = jnp.where(pos, 0.0, ce)
    ce_neg_sorted = -jnp.sort(-ce_neg, axis=1)
    n_pos = jnp.sum(pos, axis=1)
    hard = jnp.arange(P)[None, :] < (neg_pos_ratio * n_pos)[:, None]
    ce_hard_sum = jnp.sum(jnp.where(hard, ce_neg_sorted, 0.0))
    conf_loss = (ce_hard_sum + ce_pos_sum) / n_pos_tot
    return conf_loss + alpha * loc_loss


# --------------------------------------------------------------------------------------
# Self test
# --------------------------------------------------------------------------------------
if __name__ == "__main__":
    N, P, C, M = 2, 256, 8, 8
    ks = jax.random.split(jax.random.PRNGKey(0), 5)

    # Priors: 8x8 grid of centers x 4 (w, h) shapes -> 256 priors in cxcy form.
    centers = (jnp.arange(8, dtype=jnp.float32) + 0.5) / 8.0
    cx, cy = jnp.meshgrid(centers, centers, indexing="ij")
    grid_cxcy = jnp.stack([cx.reshape(-1), cy.reshape(-1)], axis=1)      # (64, 2)
    wh = jnp.array([[0.1, 0.1], [0.2, 0.2], [0.3, 0.15], [0.15, 0.3]], jnp.float32)
    priors_cxcy = jnp.concatenate(
        [jnp.repeat(grid_cxcy, 4, axis=0), jnp.tile(wh, (64, 1))], axis=1)  # (256, 4)

    predicted_locs = jax.random.normal(ks[0], (N, P, 4), jnp.float32)
    predicted_scores = jax.random.normal(ks[1], (N, P, C), jnp.float32)

    # Ground truth: per-image boxes (xy, inside [0,1]) and nonzero labels, padded to M.
    n_objects = jnp.array([3, 5], jnp.int32)
    b_cxy = jax.random.uniform(ks[2], (N, M, 2), jnp.float32, 0.25, 0.75)
    b_wh = jax.random.uniform(ks[3], (N, M, 2), jnp.float32, 0.1, 0.4)
    boxes_all = jnp.concatenate([b_cxy - b_wh / 2.0, b_cxy + b_wh / 2.0], axis=2)
    labels_all = jax.random.randint(ks[4], (N, M), 1, C)

    pad_mask = jnp.arange(M)[None, :] < n_objects[:, None]
    boxes_padded = boxes_all * pad_mask[:, :, None]
    labels_padded = labels_all * pad_mask

    loss = multibox_loss(predicted_locs, predicted_scores, boxes_padded,
                         labels_padded, n_objects, priors_cxcy)
    loss = jax.block_until_ready(loss)

    boxes_list = [boxes_all[i, :int(n_objects[i])] for i in range(N)]
    labels_list = [labels_all[i, :int(n_objects[i])] for i in range(N)]
    ref = multibox_loss_ref(predicted_locs, predicted_scores, boxes_list,
                            labels_list, priors_cxcy)
    ref = jax.block_until_ready(ref)

    if not bool(jnp.isfinite(loss)) or not bool(jnp.allclose(loss, ref, rtol=5e-4, atol=5e-4)):
        raise AssertionError(f"Pallas MultiBoxLoss mismatch: pallas={float(loss)} ref={float(ref)}")
    print("KERNEL_OK")
</pallas_src>

<mosaic_0001>
module attributes {stable_mosaic.version = 11 : i64} {
  func.func @_multibox_kernel(%arg0: i32, %arg1: memref<1x8x4xf32, #tpu.memory_space<vmem>>, %arg2: memref<1x8x1xf32, #tpu.memory_space<vmem>>, %arg3: memref<1x8x1xf32, #tpu.memory_space<vmem>>, %arg4: memref<4x256xf32, #tpu.memory_space<vmem>>, %arg5: memref<4x256xf32, #tpu.memory_space<vmem>>, %arg6: memref<1x4x256xf32, #tpu.memory_space<vmem>>, %arg7: memref<1x8x256xf32, #tpu.memory_space<vmem>>, %arg8: memref<1x1x4xf32, #tpu.memory_space<vmem>>, %arg9: memref<1x256xf32, #tpu.memory_space<vmem>>, %arg10: memref<256x1xf32, #tpu.memory_space<vmem>>) attributes {dimension_semantics = [#tpu.dimension_semantics<parallel>], iteration_bounds = array<i64: 2>, scalar_prefetch = 0 : i64, scratch_operands = 2 : i64, tpu.core_type = #tpu.core_type<tc>, window_params = [{transform_indices = @transform_0, window_bounds = array<i64: 1, 8, 4>}, {transform_indices = @transform_1, window_bounds = array<i64: 1, 8, 1>}, {transform_indices = @transform_2, window_bounds = array<i64: 1, 8, 1>}, {pipeline_mode = #tpu.pipeline_mode<synchronous>, transform_indices = @transform_3, window_bounds = array<i64: 4, 256>}, {pipeline_mode = #tpu.pipeline_mode<synchronous>, transform_indices = @transform_4, window_bounds = array<i64: 4, 256>}, {transform_indices = @transform_5, window_bounds = array<i64: 1, 4, 256>}, {transform_indices = @transform_6, window_bounds = array<i64: 1, 8, 256>}, {transform_indices = @transform_7, window_bounds = array<i64: 1, 1, 4>}]} {
    %c0 = arith.constant 0 : index
    %c0_0 = arith.constant 0 : index
    %c0_1 = arith.constant 0 : index
    %0 = vector.load %arg1[%c0, %c0_0, %c0_1] : memref<1x8x4xf32, #tpu.memory_space<vmem>>, vector<1x8x4xf32>
    %1 = vector.shape_cast %0 : vector<1x8x4xf32> to vector<8x4xf32>
    %c0_2 = arith.constant 0 : index
    %c0_3 = arith.constant 0 : index
    %c0_4 = arith.constant 0 : index
    %2 = vector.load %arg2[%c0_2, %c0_3, %c0_4] : memref<1x8x1xf32, #tpu.memory_space<vmem>>, vector<1x8x1xf32>
    %3 = vector.shape_cast %2 : vector<1x8x1xf32> to vector<8x1xf32>
    %c0_5 = arith.constant 0 : index
    %c0_6 = arith.constant 0 : index
    %c0_7 = arith.constant 0 : index
    %4 = vector.load %arg3[%c0_5, %c0_6, %c0_7] : memref<1x8x1xf32, #tpu.memory_space<vmem>>, vector<1x8x1xf32>
    %5 = vector.shape_cast %4 : vector<1x8x1xf32> to vector<8x1xf32>
    %6 = vector.extract_strided_slice %1 {offsets = [0, 0], sizes = [8, 1], strides = [1, 1]} : vector<8x4xf32> to vector<8x1xf32>
    %7 = vector.extract_strided_slice %1 {offsets = [0, 1], sizes = [8, 1], strides = [1, 1]} : vector<8x4xf32> to vector<8x1xf32>
    %8 = vector.extract_strided_slice %1 {offsets = [0, 2], sizes = [8, 1], strides = [1, 1]} : vector<8x4xf32> to vector<8x1xf32>
    %9 = vector.extract_strided_slice %1 {offsets = [0, 3], sizes = [8, 1], strides = [1, 1]} : vector<8x4xf32> to vector<8x1xf32>
    %c0_8 = arith.constant 0 : index
    %c0_9 = arith.constant 0 : index
    %10 = vector.load %arg4[%c0_8, %c0_9] : memref<4x256xf32, #tpu.memory_space<vmem>>, vector<1x256xf32>
    %c1 = arith.constant 1 : index
    %c0_10 = arith.constant 0 : index
    %11 = vector.load %arg4[%c1, %c0_10] : memref<4x256xf32, #tpu.memory_space<vmem>>, vector<1x256xf32>
    %c2 = arith.constant 2 : index
    %c0_11 = arith.constant 0 : index
    %12 = vector.load %arg4[%c2, %c0_11] : memref<4x256xf32, #tpu.memory_space<vmem>>, vector<1x256xf32>
    %c3 = arith.constant 3 : index
    %c0_12 = arith.constant 0 : index
    %13 = vector.load %arg4[%c3, %c0_12] : memref<4x256xf32, #tpu.memory_space<vmem>>, vector<1x256xf32>
    %14 = vector.broadcast %8 : vector<8x1xf32> to vector<8x256xf32>
    %15 = vector.broadcast %12 : vector<1x256xf32> to vector<8x256xf32>
    %16 = arith.minimumf %14, %15 : vector<8x256xf32>
    %17 = vector.broadcast %6 : vector<8x1xf32> to vector<8x256xf32>
    %18 = vector.broadcast %10 : vector<1x256xf32> to vector<8x256xf32>
    %19 = arith.maximumf %17, %18 : vector<8x256xf32>
    %20 = arith.subf %16, %19 : vector<8x256xf32>
    %cst = arith.constant 0.000000e+00 : f32
    %21 = vector.broadcast %cst : f32 to vector<8x256xf32>
    %22 = arith.maximumf %20, %21 : vector<8x256xf32>
    %23 = vector.broadcast %9 : vector<8x1xf32> to vector<8x256xf32>
    %24 = vector.broadcast %13 : vector<1x256xf32> to vector<8x256xf32>
    %25 = arith.minimumf %23, %24 : vector<8x256xf32>
    %26 = vector.broadcast %7 : vector<8x1xf32> to vector<8x256xf32>
    %27 = vector.broadcast %11 : vector<1x256xf32> to vector<8x256xf32>
    %28 = arith.maximumf %26, %27 : vector<8x256xf32>
    %29 = arith.subf %25, %28 : vector<8x256xf32>
    %cst_13 = arith.constant 0.000000e+00 : f32
    %30 = vector.broadcast %cst_13 : f32 to vector<8x256xf32>
    %31 = arith.maximumf %29, %30 : vector<8x256xf32>
    %32 = arith.mulf %22, %31 : vector<8x256xf32>
    %33 = arith.subf %8, %6 : vector<8x1xf32>
    %34 = arith.subf %9, %7 : vector<8x1xf32>
    %35 = arith.mulf %33, %34 : vector<8x1xf32>
    %36 = arith.subf %12, %10 : vector<1x256xf32>
    %37 = arith.subf %13, %11 : vector<1x256xf32>
    %38 = arith.mulf %36, %37 : vector<1x256xf32>
    %39 = vector.broadcast %35 : vector<8x1xf32> to vector<8x256xf32>
    %40 = vector.broadcast %38 : vector<1x256xf32> to vector<8x256xf32>
    %41 = arith.addf %39, %40 : vector<8x256xf32>
    %42 = arith.subf %41, %32 : vector<8x256xf32>
    %43 = arith.divf %32, %42 : vector<8x256xf32>
    %cst_14 = arith.constant 5.000000e-01 : f32
    %44 = vector.broadcast %cst_14 : f32 to vector<8x1xf32>
    %45 = arith.cmpf ogt, %5, %44 : vector<8x1xf32>
    %cst_15 = arith.constant -1.000000e+00 : f32
    %46 = vector.shape_cast %45 : vector<8x1xi1> to vector<8x1xi1>
    %47 = vector.broadcast %46 : vector<8x1xi1> to vector<8x256xi1>
    %48 = vector.broadcast %cst_15 : f32 to vector<8x256xf32>
    %49 = arith.select %47, %43, %48 : vector<8x256xi1>, vector<8x256xf32>
    %50 = tpu.iota {dimensions = array<i32: 0>} : vector<8x1xi32>
    %51 = arith.sitofp %50 : vector<8x1xi32> to vector<8x1xf32>
    %52 = tpu.iota {dimensions = array<i32: 1>} : vector<1x256xi32>
    %53 = arith.sitofp %52 : vector<1x256xi32> to vector<1x256xf32>
    %cst_16 = arith.constant dense<0xFF800000> : vector<256xf32>
    %54 = vector.multi_reduction <maximumf>, %49, %cst_16 [0] : vector<8x256xf32> to vector<256xf32>
    %55 = vector.shape_cast %54 : vector<256xf32> to vector<1x256xf32>
    %56 = vector.broadcast %55 : vector<1x256xf32> to vector<8x256xf32>
    %57 = arith.cmpf oeq, %49, %56 : vector<8x256xf32>
    %cst_17 = arith.constant 8.000000e+00 : f32
    %58 = vector.shape_cast %51 : vector<8x1xf32> to vector<8x1xf32>
    %59 = vector.broadcast %58 : vector<8x1xf32> to vector<8x256xf32>
    %60 = vector.broadcast %cst_17 : f32 to vector<8x256xf32>
    %61 = arith.select %57, %59, %60 : vector<8x256xi1>, vector<8x256xf32>
    %cst_18 = arith.constant dense<0x7F800000> : vector<256xf32>
    %62 = vector.multi_reduction <minimumf>, %61, %cst_18 [0] : vector<8x256xf32> to vector<256xf32>
    %63 = vector.shape_cast %62 : vector<256xf32> to vector<1x256xf32>
    %cst_19 = arith.constant dense<0xFF800000> : vector<8xf32>
    %64 = vector.multi_reduction <maximumf>, %49, %cst_19 [1] : vector<8x256xf32> to vector<8xf32>
    %65 = vector.shape_cast %64 : vector<8xf32> to vector<8x1xf32>
    %66 = vector.broadcast %65 : vector<8x1xf32> to vector<8x256xf32>
    %67 = arith.cmpf oeq, %49, %66 : vector<8x256xf32>
    %cst_20 = arith.constant 2.560000e+02 : f32
    %68 = vector.shape_cast %53 : vector<1x256xf32> to vector<1x256xf32>
    %69 = vector.broadcast %68 : vector<1x256xf32> to vector<8x256xf32>
    %70 = vector.broadcast %cst_20 : f32 to vector<8x256xf32>
    %71 = arith.select %67, %69, %70 : vector<8x256xi1>, vector<8x256xf32>
    %cst_21 = arith.constant dense<0x7F800000> : vector<8xf32>
    %72 = vector.multi_reduction <minimumf>, %71, %cst_21 [1] : vector<8x256xf32> to vector<8xf32>
    %73 = vector.shape_cast %72 : vector<8xf32> to vector<8x1xf32>
    %74 = vector.broadcast %53 : vector<1x256xf32> to vector<8x256xf32>
    %75 = vector.broadcast %73 : vector<8x1xf32> to vector<8x256xf32>
    %76 = arith.cmpf oeq, %74, %75 : vector<8x256xf32>
    %cst_22 = arith.constant 0.000000e+00 : f32
    %77 = vector.shape_cast %5 : vector<8x1xf32> to vector<8x1xf32>
    %78 = vector.broadcast %77 : vector<8x1xf32> to vector<8x256xf32>
    %79 = vector.broadcast %cst_22 : f32 to vector<8x256xf32>
    %80 = arith.select %76, %78, %79 : vector<8x256xi1>, vector<8x256xf32>
    %cst_23 = arith.constant dense<0xFF800000> : vector<256xf32>
    %81 = vector.multi_reduction <maximumf>, %80, %cst_23 [0] : vector<8x256xf32> to vector<256xf32>
    %82 = vector.shape_cast %81 : vector<256xf32> to vector<1x256xf32>
    %cst_24 = arith.constant 5.000000e-01 : f32
    %83 = vector.broadcast %cst_24 : f32 to vector<8x256xf32>
    %84 = arith.cmpf ogt, %80, %83 : vector<8x256xf32>
    %cst_25 = arith.constant -1.000000e+00 : f32
    %85 = vector.shape_cast %51 : vector<8x1xf32> to vector<8x1xf32>
    %86 = vector.broadcast %85 : vector<8x1xf32> to vector<8x256xf32>
    %87 = vector.broadcast %cst_25 : f32 to vector<8x256xf32>
    %88 = arith.select %84, %86, %87 : vector<8x256xi1>, vector<8x256xf32>
    %cst_26 = arith.constant dense<0xFF800000> : vector<256xf32>
    %89 = vector.multi_reduction <maximumf>, %88, %cst_26 [0] : vector<8x256xf32> to vector<256xf32>
    %90 = vector.shape_cast %89 : vector<256xf32> to vector<1x256xf32>
    %cst_27 = arith.constant 5.000000e-01 : f32
    %91 = vector.broadcast %cst_27 : f32 to vector<1x256xf32>
    %92 = arith.cmpf ogt, %82, %91 : vector<1x256xf32>
    %93 = arith.select %92, %90, %63 : vector<1x256xi1>, vector<1x256xf32>
    %cst_28 = arith.constant 5.000000e-01 : f32
    %94 = vector.broadcast %cst_28 : f32 to vector<1x256xf32>
    %95 = arith.cmpf ogt, %82, %94 : vector<1x256xf32>
    %cst_29 = arith.constant 1.000000e+00 : f32
    %96 = vector.broadcast %cst_29 : f32 to vector<1x256xf32>
    %97 = arith.select %95, %96, %55 : vector<1x256xi1>, vector<1x256xf32>
    %98 = vector.broadcast %51 : vector<8x1xf32> to vector<8x256xf32>
    %99 = vector.broadcast %93 : vector<1x256xf32> to vector<8x256xf32>
    %100 = arith.cmpf oeq, %98, %99 : vector<8x256xf32>
    %101 = arith.extui %100 : vector<8x256xi1> to vector<8x256xi32>
    %102 = arith.sitofp %101 : vector<8x256xi32> to vector<8x256xf32>
    %103 = vector.broadcast %3 : vector<8x1xf32> to vector<8x256xf32>
    %104 = arith.mulf %102, %103 : vector<8x256xf32>
    %cst_30 = arith.constant dense<0.000000e+00> : vector<256xf32>
    %105 = vector.multi_reduction <add>, %104, %cst_30 [0] : vector<8x256xf32> to vector<256xf32>
    %106 = vector.shape_cast %105 : vector<256xf32> to vector<1x256xf32>
    %cst_31 = arith.constant 5.000000e-01 : f32
    %107 = vector.broadcast %cst_31 : f32 to vector<1x256xf32>
    %108 = arith.cmpf olt, %97, %107 : vector<1x256xf32>
    %cst_32 = arith.constant 0.000000e+00 : f32
    %109 = vector.broadcast %cst_32 : f32 to vector<1x256xf32>
    %110 = arith.select %108, %109, %106 : vector<1x256xi1>, vector<1x256xf32>
    %cst_33 = arith.constant 5.000000e-01 : f32
    %111 = vector.broadcast %cst_33 : f32 to vector<1x256xf32>
    %112 = arith.cmpf ogt, %110, %111 : vector<1x256xf32>
    %113 = arith.extui %112 : vector<1x256xi1> to vector<1x256xi32>
    %114 = arith.sitofp %113 : vector<1x256xi32> to vector<1x256xf32>
    %115 = vector.broadcast %6 : vector<8x1xf32> to vector<8x256xf32>
    %116 = arith.mulf %102, %115 : vector<8x256xf32>
    %cst_34 = arith.constant dense<0.000000e+00> : vector<256xf32>
    %117 = vector.multi_reduction <add>, %116, %cst_34 [0] : vector<8x256xf32> to vector<256xf32>
    %118 = vector.shape_cast %117 : vector<256xf32> to vector<1x256xf32>
    %119 = vector.broadcast %7 : vector<8x1xf32> to vector<8x256xf32>
    %120 = arith.mulf %102, %119 : vector<8x256xf32>
    %cst_35 = arith.constant dense<0.000000e+00> : vector<256xf32>
    %121 = vector.multi_reduction <add>, %120, %cst_35 [0] : vector<8x256xf32> to vector<256xf32>
    %122 = vector.shape_cast %121 : vector<256xf32> to vector<1x256xf32>
    %123 = vector.broadcast %8 : vector<8x1xf32> to vector<8x256xf32>
    %124 = arith.mulf %102, %123 : vector<8x256xf32>
    %cst_36 = arith.constant dense<0.000000e+00> : vector<256xf32>
    %125 = vector.multi_reduction <add>, %124, %cst_36 [0] : vector<8x256xf32> to vector<256xf32>
    %126 = vector.shape_cast %125 : vector<256xf32> to vector<1x256xf32>
    %127 = vector.broadcast %9 : vector<8x1xf32> to vector<8x256xf32>
    %128 = arith.mulf %102, %127 : vector<8x256xf32>
    %cst_37 = arith.constant dense<0.000000e+00> : vector<256xf32>
    %129 = vector.multi_reduction <add>, %128, %cst_37 [0] : vector<8x256xf32> to vector<256xf32>
    %130 = vector.shape_cast %129 : vector<256xf32> to vector<1x256xf32>
    %131 = arith.addf %118, %126 : vector<1x256xf32>
    %cst_38 = arith.constant 5.000000e-01 : f32
    %132 = vector.broadcast %cst_38 : f32 to vector<1x256xf32>
    %133 = arith.mulf %131, %132 : vector<1x256xf32>
    %134 = arith.addf %122, %130 : vector<1x256xf32>
    %cst_39 = arith.constant 5.000000e-01 : f32
    %135 = vector.broadcast %cst_39 : f32 to vector<1x256xf32>
    %136 = arith.mulf %134, %135 : vector<1x256xf32>
    %137 = arith.subf %126, %118 : vector<1x256xf32>
    %138 = arith.subf %130, %122 : vector<1x256xf32>
    %c0_40 = arith.constant 0 : index
    %c0_41 = arith.constant 0 : index
    %139 = vector.load %arg5[%c0_40, %c0_41] : memref<4x256xf32, #tpu.memory_space<vmem>>, vector<1x256xf32>
    %c1_42 = arith.constant 1 : index
    %c0_43 = arith.constant 0 : index
    %140 = vector.load %arg5[%c1_42, %c0_43] : memref<4x256xf32, #tpu.memory_space<vmem>>, vector<1x256xf32>
    %c2_44 = arith.constant 2 : index
    %c0_45 = arith.constant 0 : index
    %141 = vector.load %arg5[%c2_44, %c0_45] : memref<4x256xf32, #tpu.memory_space<vmem>>, vector<1x256xf32>
    %c3_46 = arith.constant 3 : index
    %c0_47 = arith.constant 0 : index
    %142 = vector.load %arg5[%c3_46, %c0_47] : memref<4x256xf32, #tpu.memory_space<vmem>>, vector<1x256xf32>
    %143 = arith.subf %133, %139 : vector<1x256xf32>
    %cst_48 = arith.constant 1.000000e-01 : f32
    %144 = vector.broadcast %cst_48 : f32 to vector<1x256xf32>
    %145 = arith.mulf %141, %144 : vector<1x256xf32>
    %146 = arith.divf %143, %145 : vector<1x256xf32>
    %147 = arith.subf %136, %140 : vector<1x256xf32>
    %cst_49 = arith.constant 1.000000e-01 : f32
    %148 = vector.broadcast %cst_49 : f32 to vector<1x256xf32>
    %149 = arith.mulf %142, %148 : vector<1x256xf32>
    %150 = arith.divf %147, %149 : vector<1x256xf32>
    %151 = arith.divf %137, %141 : vector<1x256xf32>
    %152 = math.log %151 : vector<1x256xf32>
    %cst_50 = arith.constant 5.000000e+00 : f32
    %153 = vector.broadcast %cst_50 : f32 to vector<1x256xf32>
    %154 = arith.mulf %152, %153 : vector<1x256xf32>
    %155 = arith.divf %138, %142 : vector<1x256xf32>
    %156 = math.log %155 : vector<1x256xf32>
    %cst_51 = arith.constant 5.000000e+00 : f32
    %157 = vector.broadcast %cst_51 : f32 to vector<1x256xf32>
    %158 = arith.mulf %156, %157 : vector<1x256xf32>
    %c0_52 = arith.constant 0 : index
    %c0_53 = arith.constant 0 : index
    %c0_54 = arith.constant 0 : index
    %159 = vector.load %arg6[%c0_52, %c0_53, %c0_54] : memref<1x4x256xf32, #tpu.memory_space<vmem>>, vector<1x4x256xf32>
    %160 = vector.shape_cast %159 : vector<1x4x256xf32> to vector<4x256xf32>
    %161 = vector.extract_strided_slice %160 {offsets = [0, 0], sizes = [1, 256], strides = [1, 1]} : vector<4x256xf32> to vector<1x256xf32>
    %162 = arith.subf %161, %146 : vector<1x256xf32>
    %163 = math.absf %162 : vector<1x256xf32>
    %164 = vector.extract_strided_slice %160 {offsets = [1, 0], sizes = [1, 256], strides = [1, 1]} : vector<4x256xf32> to vector<1x256xf32>
    %165 = arith.subf %164, %150 : vector<1x256xf32>
    %166 = math.absf %165 : vector<1x256xf32>
    %167 = arith.addf %163, %166 : vector<1x256xf32>
    %168 = vector.extract_strided_slice %160 {offsets = [2, 0], sizes = [1, 256], strides = [1, 1]} : vector<4x256xf32> to vector<1x256xf32>
    %169 = arith.subf %168, %154 : vector<1x256xf32>
    %170 = math.absf %169 : vector<1x256xf32>
    %171 = arith.addf %167, %170 : vector<1x256xf32>
    %172 = vector.extract_strided_slice %160 {offsets = [3, 0], sizes = [1, 256], strides = [1, 1]} : vector<4x256xf32> to vector<1x256xf32>
    %173 = arith.subf %172, %158 : vector<1x256xf32>
    %174 = math.absf %173 : vector<1x256xf32>
    %175 = arith.addf %171, %174 : vector<1x256xf32>
    %cst_55 = arith.constant 5.000000e-01 : f32
    %176 = vector.broadcast %cst_55 : f32 to vector<1x256xf32>
    %177 = arith.cmpf ogt, %114, %176 : vector<1x256xf32>
    %cst_56 = arith.constant 0.000000e+00 : f32
    %178 = vector.broadcast %cst_56 : f32 to vector<1x256xf32>
    %179 = arith.select %177, %175, %178 : vector<1x256xi1>, vector<1x256xf32>
    %cst_57 = arith.constant dense<0.000000e+00> : vector<1xf32>
    %180 = vector.multi_reduction <add>, %179, %cst_57 [1] : vector<1x256xf32> to vector<1xf32>
    %181 = vector.shape_cast %180 : vector<1xf32> to vector<1x1xf32>
    %c0_58 = arith.constant 0 : index
    %c0_59 = arith.constant 0 : index
    %c0_60 = arith.constant 0 : index
    %182 = vector.load %arg7[%c0_58, %c0_59, %c0_60] : memref<1x8x256xf32, #tpu.memory_space<vmem>>, vector<1x8x256xf32>
    %183 = vector.shape_cast %182 : vector<1x8x256xf32> to vector<8x256xf32>
    %cst_61 = arith.constant dense<0xFF800000> : vector<256xf32>
    %184 = vector.multi_reduction <maximumf>, %183, %cst_61 [0] : vector<8x256xf32> to vector<256xf32>
    %185 = vector.shape_cast %184 : vector<256xf32> to vector<1x256xf32>
    %186 = vector.broadcast %185 : vector<1x256xf32> to vector<8x256xf32>
    %187 = arith.subf %183, %186 : vector<8x256xf32>
    %188 = math.exp %187 : vector<8x256xf32>
    %cst_62 = arith.constant dense<0.000000e+00> : vector<256xf32>
    %189 = vector.multi_reduction <add>, %188, %cst_62 [0] : vector<8x256xf32> to vector<256xf32>
    %190 = vector.shape_cast %189 : vector<256xf32> to vector<1x256xf32>
    %191 = math.log %190 : vector<1x256xf32>
    %192 = arith.addf %185, %191 : vector<1x256xf32>
    %193 = tpu.iota {dimensions = array<i32: 0>} : vector<8x1xi32>
    %194 = arith.sitofp %193 : vector<8x1xi32> to vector<8x1xf32>
    %195 = vector.broadcast %194 : vector<8x1xf32> to vector<8x256xf32>
    %196 = vector.broadcast %110 : vector<1x256xf32> to vector<8x256xf32>
    %197 = arith.cmpf oeq, %195, %196 : vector<8x256xf32>
    %cst_63 = arith.constant 0.000000e+00 : f32
    %198 = vector.broadcast %cst_63 : f32 to vector<8x256xf32>
    %199 = arith.select %197, %183, %198 : vector<8x256xi1>, vector<8x256xf32>
    %cst_64 = arith.constant dense<0.000000e+00> : vector<256xf32>
    %200 = vector.multi_reduction <add>, %199, %cst_64 [0] : vector<8x256xf32> to vector<256xf32>
    %201 = vector.shape_cast %200 : vector<256xf32> to vector<1x256xf32>
    %202 = arith.subf %192, %201 : vector<1x256xf32>
    %cst_65 = arith.constant dense<0.000000e+00> : vector<1xf32>
    %203 = vector.multi_reduction <add>, %114, %cst_65 [1] : vector<1x256xf32> to vector<1xf32>
    %204 = vector.shape_cast %203 : vector<1xf32> to vector<1x1xf32>
    %cst_66 = arith.constant 5.000000e-01 : f32
    %205 = vector.broadcast %cst_66 : f32 to vector<1x256xf32>
    %206 = arith.cmpf ogt, %114, %205 : vector<1x256xf32>
    %cst_67 = arith.constant 0.000000e+00 : f32
    %207 = vector.broadcast %cst_67 : f32 to vector<1x256xf32>
    %208 = arith.select %206, %202, %207 : vector<1x256xi1>, vector<1x256xf32>
    %cst_68 = arith.constant dense<0.000000e+00> : vector<1xf32>
    %209 = vector.multi_reduction <add>, %208, %cst_68 [1] : vector<1x256xf32> to vector<1xf32>
    %210 = vector.shape_cast %209 : vector<1xf32> to vector<1x1xf32>
    %cst_69 = arith.constant 5.000000e-01 : f32
    %211 = vector.broadcast %cst_69 : f32 to vector<1x256xf32>
    %212 = arith.cmpf ogt, %114, %211 : vector<1x256xf32>
    %cst_70 = arith.constant 0.000000e+00 : f32
    %213 = vector.broadcast %cst_70 : f32 to vector<1x256xf32>
    %214 = arith.select %212, %213, %202 : vector<1x256xi1>, vector<1x256xf32>
    %cst_71 = arith.constant 3.000000e+00 : f32
    %215 = vector.broadcast %cst_71 : f32 to vector<1x1xf32>
    %216 = arith.mulf %215, %204 : vector<1x1xf32>
    %c0_72 = arith.constant 0 : index
    %c0_73 = arith.constant 0 : index
    %217 = vector.load %arg9[%c0_72, %c0_73] : memref<1x256xf32, #tpu.memory_space<vmem>>, vector<1x256xf32>
    tpu.vector_store %arg9[%c0_72, %c0_73], %214 {strides = array<i32>} : memref<1x256xf32, #tpu.memory_space<vmem>>, vector<1x256xf32>,
    %218 = tpu.iota {dimensions = array<i32: 0>} : vector<128x128xi32>
    %219 = tpu.iota {dimensions = array<i32: 1>} : vector<128x128xi32>
    %220 = arith.cmpi eq, %218, %219 : vector<128x128xi32>
    %221 = arith.extui %220 : vector<128x128xi1> to vector<128x128xi32>
    %222 = arith.sitofp %221 : vector<128x128xi32> to vector<128x128xf32>
    %223 = vector.extract_strided_slice %214 {offsets = [0, 0], sizes = [1, 128], strides = [1, 1]} : vector<1x256xf32> to vector<1x128xf32>
    %224 = vector.broadcast %223 : vector<1x128xf32> to vector<128x128xf32>
    %225 = arith.mulf %222, %224 : vector<128x128xf32>
    %cst_74 = arith.constant dense<0.000000e+00> : vector<128xf32>
    %226 = vector.multi_reduction <add>, %225, %cst_74 [1] : vector<128x128xf32> to vector<128xf32>
    %227 = vector.shape_cast %226 : vector<128xf32> to vector<128x1xf32>
    %c0_75 = arith.constant 0 : index
    %c0_76 = arith.constant 0 : index
    %228 = vector.load %arg10[%c0_75, %c0_76] : memref<256x1xf32, #tpu.memory_space<vmem>>, vector<128x1xf32>
    tpu.vector_store %arg10[%c0_75, %c0_76], %227 {strides = array<i32>} : memref<256x1xf32, #tpu.memory_space<vmem>>, vector<128x1xf32>,
    %229 = vector.extract_strided_slice %214 {offsets = [0, 128], sizes = [1, 128], strides = [1, 1]} : vector<1x256xf32> to vector<1x128xf32>
    %230 = vector.broadcast %229 : vector<1x128xf32> to vector<128x128xf32>
    %231 = arith.mulf %222, %230 : vector<128x128xf32>
    %cst_77 = arith.constant dense<0.000000e+00> : vector<128xf32>
    %232 = vector.multi_reduction <add>, %231, %cst_77 [1] : vector<128x128xf32> to vector<128xf32>
    %233 = vector.shape_cast %232 : vector<128xf32> to vector<128x1xf32>
    %c128 = arith.constant 128 : index
    %c0_78 = arith.constant 0 : index
    %234 = vector.load %arg10[%c128, %c0_78] : memref<256x1xf32, #tpu.memory_space<vmem>>, vector<128x1xf32>
    tpu.vector_store %arg10[%c128, %c0_78], %233 {strides = array<i32>} : memref<256x1xf32, #tpu.memory_space<vmem>>, vector<128x1xf32>,
    %cst_79 = arith.constant 0.000000e+00 : f32
    %235 = vector.broadcast %cst_79 : f32 to vector<1x1xf32>
    %c0_i32 = arith.constant 0 : i32
    %c2_i32 = arith.constant 2 : i32
    %236 = arith.addi %c0_i32, %c2_i32 : i32
    %c1_i32 = arith.constant 1 : i32
    %237 = scf.for %arg11 = %c0_i32 to %236 step %c1_i32 iter_args(%arg12 = %235) -> (vector<1x1xf32>)  : i32 {
      %c128_i32 = arith.constant 128 : i32
      %250 = arith.muli %arg11, %c128_i32 : i32
      %251 = tpu.assume_multiple %250, 128 : i32
      %252 = arith.index_cast %251 : i32 to index
      %c0_93 = arith.constant 0 : index
      %253 = vector.load %arg10[%252, %c0_93] : memref<256x1xf32, #tpu.memory_space<vmem>>, vector<128x1xf32>
      %c0_94 = arith.constant 0 : index
      %c0_95 = arith.constant 0 : index
      %254 = vector.load %arg9[%c0_94, %c0_95] : memref<1x256xf32, #tpu.memory_space<vmem>>, vector<1x256xf32>
      %255 = vector.broadcast %254 : vector<1x256xf32> to vector<128x256xf32>
      %256 = vector.broadcast %253 : vector<128x1xf32> to vector<128x256xf32>
      %257 = arith.cmpf ogt, %255, %256 : vector<128x256xf32>
      %258 = arith.extui %257 : vector<128x256xi1> to vector<128x256xi32>
      %259 = arith.sitofp %258 : vector<128x256xi32> to vector<128x256xf32>
      %cst_96 = arith.constant dense<0.000000e+00> : vector<128xf32>
      %260 = vector.multi_reduction <add>, %259, %cst_96 [1] : vector<128x256xf32> to vector<128xf32>
      %261 = vector.shape_cast %260 : vector<128xf32> to vector<128x1xf32>
      %262 = vector.broadcast %216 : vector<1x1xf32> to vector<128x1xf32>
      %263 = arith.cmpf olt, %261, %262 : vector<128x1xf32>
      %264 = arith.extui %263 : vector<128x1xi1> to vector<128x1xi32>
      %265 = arith.sitofp %264 : vector<128x1xi32> to vector<128x1xf32>
      %266 = arith.mulf %253, %265 : vector<128x1xf32>
      %cst_97 = arith.constant dense<0.000000e+00> : vector<1xf32>
      %267 = vector.multi_reduction <add>, %266, %cst_97 [0] : vector<128x1xf32> to vector<1xf32>
      %268 = vector.shape_cast %267 : vector<1xf32> to vector<1x1xf32>
      %269 = arith.addf %arg12, %268 : vector<1x1xf32>
      scf.yield %269 : vector<1x1xf32>
    }
    %c2_i32_80 = arith.constant 2 : i32
    %c0_81 = arith.constant 0 : index
    %c0_82 = arith.constant 0 : index
    %c0_83 = arith.constant 0 : index
    %238 = vector.load %arg8[%c0_81, %c0_82, %c0_83] : memref<1x1x4xf32, #tpu.memory_space<vmem>>, vector<1x1x1xf32>
    %239 = vector.shape_cast %238 : vector<1x1x1xf32> to vector<1x1xf32>
    %240 = vector.shape_cast %204 : vector<1x1xf32> to vector<1x1x1xf32>
    tpu.vector_store %arg8[%c0_81, %c0_82, %c0_83], %240 {strides = array<i32>} : memref<1x1x4xf32, #tpu.memory_space<vmem>>, vector<1x1x1xf32>,
    %c0_84 = arith.constant 0 : index
    %c0_85 = arith.constant 0 : index
    %c1_86 = arith.constant 1 : index
    %241 = vector.load %arg8[%c0_84, %c0_85, %c1_86] : memref<1x1x4xf32, #tpu.memory_space<vmem>>, vector<1x1x1xf32>
    %242 = vector.shape_cast %241 : vector<1x1x1xf32> to vector<1x1xf32>
    %243 = vector.shape_cast %181 : vector<1x1xf32> to vector<1x1x1xf32>
    tpu.vector_store %arg8[%c0_84, %c0_85, %c1_86], %243 {strides = array<i32>} : memref<1x1x4xf32, #tpu.memory_space<vmem>>, vector<1x1x1xf32>,
    %c0_87 = arith.constant 0 : index
    %c0_88 = arith.constant 0 : index
    %c2_89 = arith.constant 2 : index
    %244 = vector.load %arg8[%c0_87, %c0_88, %c2_89] : memref<1x1x4xf32, #tpu.memory_space<vmem>>, vector<1x1x1xf32>
    %245 = vector.shape_cast %244 : vector<1x1x1xf32> to vector<1x1xf32>
    %246 = vector.shape_cast %210 : vector<1x1xf32> to vector<1x1x1xf32>
    tpu.vector_store %arg8[%c0_87, %c0_88, %c2_89], %246 {strides = array<i32>} : memref<1x1x4xf32, #tpu.memory_space<vmem>>, vector<1x1x1xf32>,
    %c0_90 = arith.constant 0 : index
    %c0_91 = arith.constant 0 : index
    %c3_92 = arith.constant 3 : index
    %247 = vector.load %arg8[%c0_90, %c0_91, %c3_92] : memref<1x1x4xf32, #tpu.memory_space<vmem>>, vector<1x1x1xf32>
    %248 = vector.shape_cast %247 : vector<1x1x1xf32> to vector<1x1xf32>
    %249 = vector.shape_cast %237 : vector<1x1xf32> to vector<1x1x1xf32>
    tpu.vector_store %arg8[%c0_90, %c0_91, %c3_92], %249 {strides = array<i32>} : memref<1x1x4xf32, #tpu.memory_space<vmem>>, vector<1x1x1xf32>,
    return
  }
  func.func @transform_0(%arg0: i32) -> (i32, i32, i32) {
    %c0_i32 = arith.constant 0 : i32
    %c0_i32_0 = arith.constant 0 : i32
    %c0_i32_1 = arith.constant 0 : i32
    return %arg0, %c0_i32, %c0_i32_0 : i32, i32, i32
  }
  func.func @transform_1(%arg0: i32) -> (i32, i32, i32) {
    %c0_i32 = arith.constant 0 : i32
    %c0_i32_0 = arith.constant 0 : i32
    %c0_i32_1 = arith.constant 0 : i32
    return %arg0, %c0_i32, %c0_i32_0 : i32, i32, i32
  }
  func.func @transform_2(%arg0: i32) -> (i32, i32, i32) {
    %c0_i32 = arith.constant 0 : i32
    %c0_i32_0 = arith.constant 0 : i32
    %c0_i32_1 = arith.constant 0 : i32
    return %arg0, %c0_i32, %c0_i32_0 : i32, i32, i32
  }
  func.func @transform_3(%arg0: i32) -> (i32, i32) {
    %c0_i32 = arith.constant 0 : i32
    %c0_i32_0 = arith.constant 0 : i32
    %c0_i32_1 = arith.constant 0 : i32
    return %c0_i32, %c0_i32_0 : i32, i32
  }
  func.func @transform_4(%arg0: i32) -> (i32, i32) {
    %c0_i32 = arith.constant 0 : i32
    %c0_i32_0 = arith.constant 0 : i32
    %c0_i32_1 = arith.constant 0 : i32
    return %c0_i32, %c0_i32_0 : i32, i32
  }
  func.func @transform_5(%arg0: i32) -> (i32, i32, i32) {
    %c0_i32 = arith.constant 0 : i32
    %c0_i32_0 = arith.constant 0 : i32
    %c0_i32_1 = arith.constant 0 : i32
    return %arg0, %c0_i32, %c0_i32_0 : i32, i32, i32
  }
  func.func @transform_6(%arg0: i32) -> (i32, i32, i32) {
    %c0_i32 = arith.constant 0 : i32
    %c0_i32_0 = arith.constant 0 : i32
    %c0_i32_1 = arith.constant 0 : i32
    return %arg0, %c0_i32, %c0_i32_0 : i32, i32, i32
  }
  func.func @transform_7(%arg0: i32) -> (i32, i32, i32) {
    %c0_i32 = arith.constant 0 : i32
    %c0_i32_0 = arith.constant 0 : i32
    %c0_i32_1 = arith.constant 0 : i32
    return %arg0, %c0_i32, %c0_i32_0 : i32, i32, i32
  }
}

</mosaic_0001>

<bundles_post_ra>
// kernel: tpu_custom_call.1
= control target key start
LH: loop header
LB: loop body
LE: loop exit
PB: predicated region body
PF: predicated region fallthrough
CT: control target
= control target key end

     0   :  { %12 = vsyncpa [#allocation5], 0  ;;  %s2732_s0 = inlined_call_operand.vmem [shape: f32[2,8,4], index: 0, kind: input, shape index: {}]   ;;  %s2733_s1 = inlined_call_operand.vmem [shape: f32[2,8,1], index: 1, kind: input, shape index: {}]   ;;  %s2734_s2 = inlined_call_operand.vmem [shape: f32[2,8,1], index: 2, kind: input, shape index: {}]   ;;  %s2735_s3 = inlined_call_operand.vmem [shape: f32[4,256], index: 3, kind: input, shape index: {}]   ;;  %s2736_s4 = inlined_call_operand.vmem [shape: f32[4,256], index: 4, kind: input, shape index: {}]   ;;  %s2737_s5 = inlined_call_operand.vmem [shape: f32[2,4,256], index: 5, kind: input, shape index: {}]   ;;  %s2738_s6 = inlined_call_operand.vmem [shape: f32[2,8,256], index: 6, kind: input, shape index: {}]   ;;  %s2739_s7 = inlined_call_operand.hbm [shape: f32[2,1,4], index: 7, kind: output, shape index: {}]  }
   0x1   :  { %14 = vsyncpa [#allocation5 + $0x1], 0  ;;  %s1961_s24 = smov 0   ;;  %s1963_s25 = smov 0  }
   0x2   :  { %s1965_s26 = smov 0   ;;  %s1967_s27 = smov 0  }
   0x3 LB: > { %s1982_s28 = sadd.s32 4294967295, %s1899_s27   ;;  %s1626_s29 = sadd.s32 4294967294, %s1899_s27   ;;  %s1899_s27 = sphi %s1967_s27, %s2746_s27   ;;  %s1895_s26 = sphi %s1965_s26, %s2745_s26   ;;  %s1891_s25 = sphi %s1963_s25, %s2744_s25   ;;  %s1887_s24 = sphi %s1961_s24, %s2743_s24  }
   0x4   : > { %s1986_s30 = sadd.s32 1, %s1899_s27   ;;  %s199_s8 = sadd.s32 1, %s1895_s26 }
   0x5   : > { %s196_s9 = ssub.s32 %s1899_s27, %s1986_s30  ;;  %p209_p0 = scmp.ne.s32.totalorder %s1895_s26, %s1891_s25 }
   0x6   : > { %p197_p1 = scmp.eq.s32.totalorder %s196_s9, 0  ;;  %p210_p2 = scmp.eq.s32.totalorder %s1982_s28, 1 }
   0x7   : > { %p215_p3 = scmp.ne.s32.totalorder %s1891_s25, %s1887_s24  ;;  %p216_p4 = scmp.eq.s32.totalorder %s1626_s29, 1 }
   0x8   : > { %s1997_s10 = scalar_select %p197_p1, %s1895_s26, %s199_s8  }
   0x9   : > { %p1999_p5 = por %p210_p2, %p209_p0  ;;  %p2003_p6 = por %p216_p4, %p215_p3 }
   0xa   : > { %p1629_p7 = scmp.ge.s32.totalorder %s1899_s27, 1  ;;  %p277_p8 = scmp.lt.s32.totalorder %s1899_s27, 3 }
   0xc   : > { %p278_p9 = pnand %p1629_p7, %p277_p8 }
   0xd   : > { %p325_p10 = scmp.lt.s32.totalorder (!%p278_p9), %s1982_s28, 1  ;;  %s1911_s18 = smov (!%p278_p9), 2  }
   0xe   : > { %281 = sbr.rel (%p278_p9) target bundleno = 1396 (0x574), region = 48  ;;  %s1914_s22 = smov (!%p278_p9), 127  }
  0x13   : > { %v1909_v0 = vmov 2   ;;  %v1910_v1 = vmov 3   ;;  %s2011_s13 = scalar_select %p325_p10, %s1982_s28, 1  ;;  %v1912_v3 = vmov 0   ;;  %v1913_v4 = vmov 1  }
  0x14   : > { %1786 = vset.pattern.permute.xlu1 %v1909_v0  ;;  %1788 = vset.pattern.permute.xlu0 %v1910_v1  ;;  %v363_v11 = vlaneseq  ;;  %v1638_v17 = vld [vmem:[%s2735_s3 + $0x2] ss:$4 sm:$0x3]  ;;  %v350_v18 = vld [vmem:[%s2735_s3] ss:$4 sm:$0x3] }
  0x15   : > { %s2014_s14 = sshll.u32 %s2011_s13, 3  ;;  %v1637_v19 = vld [vmem:[%s2735_s3 + $0x1] ss:$4 sm:$0x3]  ;;  %v445_v31 = vsub.f32 %v1638_v17, %v350_v18 }
  0x16   : > { %s328_s17 = scalar_lea.vmem %s2732_s0, %s2014_s14  ;;  %s336_s21 = scalar_lea.vmem %s2734_s2, %s2014_s14  ;;  %v2030_v13 = vshrl.u32 %v363_v11, 7  ;;  %v1639_v20 = vld [vmem:[%s2735_s3 + $0x3] ss:$4 sm:$0x3] }
  0x17   : > { %v347_v2 = vld [vmem:[%s328_s17] sm:$0xff]  ;;  %v446_v32 = vsub.f32 %v1639_v20, %v1637_v19  ;;  %s341_s23 = scalar_lea.vmem %s2737_s5, %s2014_s14 }
  0x18   : > { %436 = vrot.lane.b32.xlu0 %v347_v2, %s1911_s18  ;;  %359 = vperm.xlu1 %1786, %v347_v2   ;;  %v2024_v7 = vld [vmem:[%s336_s21] sm:$0xff]  ;;  %v2033_v14 = vsub.s32 0, %v2030_v13  ;;  %v2036_v15 = vsub.s32 1, %v2030_v13  ;;  %s332_s21 = scalar_lea.vmem %s2733_s1, %s2014_s14  ;;  %s323_s14 = sand.u32 1, %s1891_s25  }
  0x19   : > { %vm472_vm0 = vcmp.gt.f32.partialorder %v2024_v7, 0.5  ;;  %v447_v41 = vmul.f32 %v446_v32, %v445_v31  ;;  %s2482_s29 = scalar_lea.vmem [#allocation4], %s323_s14 }
  0x1a   : > { %v473_v8 = vsel %vm472_vm0, 1, %v1912_v3  ;;  %v366_v21 = vrot.slane %v1638_v17, %v2033_v14  ;;  %v370_v22 = vrot.slane %v1638_v17, %v2036_v15  ;;  %v383_v23 = vrot.slane %v350_v18, %v2033_v14  ;;  %v348_v17 = vld [vmem:[%s332_s21] sm:$0xff] }
  0x1b   : > { %v387_v24 = vrot.slane %v350_v18, %v2036_v15  ;;  %v421_v25 = vrot.slane %v1637_v19, %v2033_v14  ;;  %v425_v26 = vrot.slane %v1637_v19, %v2036_v15  ;;  %v404_v27 = vrot.slane %v1639_v20, %v2033_v14 }
  0x1c   : > { %1787 = vset.pattern.permute.xlu1 %v1912_v3  ;;  %v408_v28 = vrot.slane %v1639_v20, %v2036_v15  ;;  %v457_v46 = vrot.slane %v447_v41, %v2033_v14  ;;  %v461_v47 = vrot.slane %v447_v41, %v2036_v15 }
  0x1d   : > { %376 = vperm.xlu1 %1787, %v347_v2  }
  0x21   : > { %1789 = vset.pattern.permute.xlu1 %v1913_v4 }
  0x22   : > { %414 = vperm.xlu1 %1789, %v347_v2  }
  0x26   : > { %1790 = vset.pattern.permute.xlu1 %v1909_v0 }
  0x8a   : > { %v437_v5 = vpop.permute.xlu0 %436 }
  0x8b   : > { %v439_v6 = vsub.f32 %v347_v2, %v437_v5 }
  0x8d   : > { %441 = vrot.lane.b32.xlu0 %v439_v6, %s1914_s22  ;;  %s1719_s22 = sshll.u32 %s2011_s13, 4 }
  0x8e   : > { %s346_s8 = scalar_lea.vmem %s2738_s6, %s1719_s22 }
  0x8f   : > { %v2095_v18 = vld [vmem:[%s346_s8] sm:$0xff]  ;;  %v2098_v20 = vld [vmem:[%s346_s8 + $0x8] sm:$0xff]  ;;  %s2486_s8 = smov 0  }
  0x90   : > { %v845_v19 = vrot.slane %v2095_v18, 4 }
  0x91   : > { %397 = vperm.xlu0 %1788, %v347_v2  }
  0x93   : > { %v2027_v12 = vpop.permute.xlu1 %359 }
  0x94   : > { %v373_v33 = vmin.f32 %v2027_v12, %v366_v21  ;;  %v374_v34 = vmin.f32 %v2027_v12, %v370_v22  ;;  %v846_v21 = vmax.f32 %v2095_v18, %v845_v19  ;;  %v851_v22 = vrot.slane %v2098_v20, 4 }
  0x95   : > { %1791 = vset.pattern.permute.xlu0 %v1912_v3 }
  0x96   : > { %475 = vperm.xlu0 %1791, %v473_v8  }
  0x98   : > { %v2038_v16 = vpop.permute.xlu1 %376 }
  0x99   : > { %v390_v35 = vmax.f32 %v2038_v16, %v383_v23  ;;  %v391_v36 = vmax.f32 %v2038_v16, %v387_v24  ;;  %v847_v23 = vrot.slane %v846_v21, 2  ;;  %v852_v24 = vmax.f32 %v2098_v20, %v851_v22 }
  0x9b   : > { %v392_v42 = vsub.f32 %v373_v33, %v390_v35  ;;  %v393_v43 = vsub.f32 %v374_v34, %v391_v36 }
  0x9d   : > { %v2060_v29 = vpop.permute.xlu1 %414  ;;  %v394_v48 = vmax.f32 %v392_v42, 0.0  ;;  %v395_v49 = vmax.f32 %v393_v43, 0.0 }
  0x9e   : > { %v428_v37 = vmax.f32 %v2060_v29, %v421_v25  ;;  %v429_v38 = vmax.f32 %v2060_v29, %v425_v26  ;;  %v848_v25 = vmax.f32 %v846_v21, %v847_v23  ;;  %v853_v26 = vrot.slane %v852_v24, 2 }
  0xff   : > { %v442_v9 = vpop.permute.xlu0 %441 }
 0x100   : > { %v444_v10 = vmul.f32 %v442_v9, %v439_v6 }
 0x102   : > { %450 = vperm.xlu1 %1790, %v444_v10  }
 0x106   : > { %1792 = vset.pattern.permute.xlu1 %v1912_v3  ;;  %v2076_v3 = vand.u32 127, %v363_v11 }
 0x108   : > { %v2079_v4 = vadd.s32 128, %v2076_v3  ;;  %v486_v5 = vcvt.s32.f32 %v2076_v3 }
 0x10a   : > { %v487_v6 = vcvt.s32.f32 %v2079_v4 }
 0x10c   : > { %v2062_v30 = vpop.permute.xlu0 %397 }
 0x10d   : > { %v411_v39 = vmin.f32 %v2062_v30, %v404_v27  ;;  %v412_v40 = vmin.f32 %v2062_v30, %v408_v28  ;;  %v849_v27 = vrot.slane %v848_v25, 1  ;;  %v854_v28 = vmax.f32 %v852_v24, %v853_v26 }
 0x10f   : > { %v430_v44 = vsub.f32 %v411_v39, %v428_v37  ;;  %v431_v45 = vsub.f32 %v412_v40, %v429_v38  ;;  %v2103_v31 = vmax.f32 %v848_v25, %v849_v27  ;;  %v855_v32 = vrot.slane %v854_v28, 1 }
 0x111   : > { %v432_v50 = vmax.f32 %v430_v44, 0.0  ;;  %v433_v51 = vmax.f32 %v431_v45, 0.0  ;;  %v476_v59 = vpop.permute.xlu0 %475  ;;  %v2105_v35 = vmax.f32 %v854_v28, %v855_v32  ;;  %v857_v36 = vsub.f32 %v2095_v18, %v2103_v31 }
 0x112   : > { %vm477_vm1 = vcmp.eq.s32.totalorder %v476_v59, 1 }
 0x113   : > { %v434_v53 = vmul.f32 %v432_v50, %v394_v48  ;;  %v435_v54 = vmul.f32 %v433_v51, %v395_v49  ;;  %v858_v39 = vsub.f32 %v2098_v20, %v2105_v35  ;;  %v859_v40 = vmul.f32 1.442695, %v857_v36 }
 0x114   : > { %v2116_v51 = vcvt.s32.f32 %v2030_v13 }
 0x115   : > { %v861_v43 = vmul.f32 1.442695, %v858_v39 }
 0x17d   : > { %v451_v52 = vpop.permute.xlu1 %450 }
 0x17e   : > { %v464_v55 = vadd.f32 %v457_v46, %v451_v52  ;;  %v465_v56 = vadd.f32 %v461_v47, %v451_v52 }
 0x180   : > { %v466_v57 = vsub.f32 %v464_v55, %v434_v53  ;;  %v467_v58 = vsub.f32 %v465_v56, %v435_v54 }
 0x182   : > { %1793 = vrcp.f32 %v466_v57 }
 0x183   : > { %1795 = vrcp.f32 %v467_v58 }
 0x184   : > { %1797 = vpow2.f32 %v859_v40 }
 0x185   : > { %1799 = vpow2.f32 %v861_v43 }
 0x18f   : > { %v1794_v60 = vpop.eup %1793 }
 0x190   : > { %v1796_v61 = vpop.eup %1795  ;;  %v469_v62 = vmul.f32 %v1794_v60, %v434_v53 }
 0x191   : > { %v471_v63 = vmul.f32 %v1796_v61, %v435_v54  ;;  %v1798_v50 = vpop.eup %1797 }
 0x192   : > { %v478_v0 = vsel %vm477_vm1, %v469_v62, -1.0  ;;  %v863_v52 = vrot.slane %v1798_v50, 4  ;;  %v1800_v53 = vpop.eup %1799 }
 0x193   : > { %v479_v1 = vsel %vm477_vm1, %v471_v63, -1.0  ;;  %v488_v33 = vrot.slane %v478_v0, 4  ;;  %v869_v57 = vrot.slane %v1800_v53, 4 }
 0x194   : > { %v516_v2 = vmax.f32 %v478_v0, %v479_v1  ;;  %v494_v34 = vrot.slane %v479_v1, 4  ;;  %v864_v56 = vadd.f32 %v1798_v50, %v863_v52 }
 0x195   : > { %v489_v37 = vmax.f32 %v478_v0, %v488_v33  ;;  %v870_v61 = vadd.f32 %v1800_v53, %v869_v57 }
 0x196   : > { %517 = vmax.xlane.f32.xlu1 %v516_v2  ;;  %v495_v38 = vmax.f32 %v479_v1, %v494_v34  ;;  %v865_v60 = vrot.slane %v864_v56, 2 }
 0x197   : > { %v490_v41 = vrot.slane %v489_v37, 2 }
 0x198   : > { %v496_v42 = vrot.slane %v495_v38, 2 }
 0x199   : > { %v491_v44 = vmax.f32 %v489_v37, %v490_v41 }
 0x19a   : > { %v497_v45 = vmax.f32 %v495_v38, %v496_v42 }
 0x19b   : > { %v492_v46 = vrot.slane %v491_v44, 1 }
 0x19c   : > { %v498_v47 = vrot.slane %v497_v45, 1 }
 0x19d   : > { %v2111_v48 = vmax.f32 %v491_v44, %v492_v46 }
 0x19e   : > { %v2113_v49 = vmax.f32 %v497_v45, %v498_v47 }
 0x19f   : > { %vm500_vm4 = vcmp.eq.f32.partialorder %v478_v0, %v2111_v48 }
 0x1a0   : > { %vm501_vm5 = vcmp.eq.f32.partialorder %v479_v1, %v2113_v49  ;;  %v502_v54 = vsel %vm500_vm4, %v2116_v51, 8.0  ;;  %vm948_vm4 = vcmp.eq.s32.totalorder %v2030_v13, %v2076_v3 }
 0x1a1   : > { %v503_v55 = vsel %vm501_vm5, %v2116_v51, 8.0  ;;  %v504_v58 = vrot.slane %v502_v54, 4 }
 0x1a2   : > { %v510_v59 = vrot.slane %v503_v55, 4 }
 0x1a3   : > { %v505_v62 = vmin.f32 %v502_v54, %v504_v58 }
 0x1a4   : > { %v511_v63 = vmin.f32 %v503_v55, %v510_v59 }
 0x1a7   : > { %530 = vperm.xlu1 %1792, %v2024_v7  }
 0x21f   : > { %v518_v8 = vpop.xlane.xlu1 %517 }
 0x220   : > { %vm519_vm2 = vcmp.eq.f32.partialorder %v478_v0, %v518_v8  ;;  %vm520_vm3 = vcmp.eq.f32.partialorder %v479_v1, %v518_v8  ;;  %v871_v0 = vrot.slane %v870_v61, 2  ;;  %v506_v1 = vrot.slane %v505_v62, 2 }
 0x221   : > { %v521_v9 = vsel %vm519_vm2, %v486_v5, 256.0  ;;  %v522_v10 = vsel %vm520_vm3, %v487_v6, 256.0 }
 0x222   : > { %v523_v7 = vmin.f32 %v521_v9, %v522_v10  ;;  %v866_v9 = vadd.f32 %v865_v60, %v864_v56  ;;  %v512_v10 = vrot.slane %v511_v63, 2  ;;  %v872_v25 = vadd.f32 %v871_v0, %v870_v61  ;;  %v2137_v61 = vld [vmem:[%s2736_s4 + $0x2] ss:$4 sm:$0x3] }
 0x223   : > { %v531_v2 = vpop.permute.xlu1 %530  ;;  %v507_v4 = vmin.f32 %v505_v62, %v506_v1  ;;  %v2150_v1 = vld [vmem:[%s2736_s4 + $0x3] ss:$4 sm:$0x3] }
 0x224   : > { %524 = vmin.xlane.f32.xlu0 %v523_v7  ;;  %v867_v24 = vrot.slane %v866_v9, 1  ;;  %v873_v38 = vrot.slane %v872_v25, 1 }
 0x225   : > { %v508_v43 = vrot.slane %v507_v4, 1 }
 0x226   : > { %v868_v37 = vadd.f32 %v867_v24, %v866_v9  ;;  %v874_v52 = vadd.f32 %v873_v38, %v872_v25  ;;  %v2160_v25 = vmul.f32 0.1, %v2150_v1 }
 0x227   : > { %v509_v57 = vmin.f32 %v507_v4, %v508_v43 }
 0x228   : > { %1801 = vlog2.f32 %v868_v37 }
 0x229   : > { %1803 = vlog2.f32 %v874_v52  ;;  %v1916_v52 = vmov 1966171168  }
 0x23a   : > { %577 = vperm.xlu0 %1791, %v348_v17  }
 0x2ad   : > { %v525_v8 = vpop.xlane.xlu0 %524 }
 0x2ae   : > { %vm526_vm6 = vcmp.eq.f32.partialorder %v486_v5, %v525_v8  ;;  %vm527_vm7 = vcmp.eq.f32.partialorder %v487_v6, %v525_v8  ;;  %v513_v6 = vmin.f32 %v511_v63, %v512_v10  ;;  %v1915_v8 = vmov 0.0  }
 0x2af   : > { %v533_v7 = vsel %vm526_vm6, %v531_v2, 0.0  ;;  %v534_v17 = vsel %vm527_vm7, %v531_v2, 0.0  ;;  %v741_v10 = vrot.slane %v2137_v61, %v2033_v14 }
 0x2b0   : > { %v535_v19 = vrot.slane %v533_v7, 4  ;;  %v541_v21 = vrot.slane %v534_v17, 4  ;;  %vm547_vm8 = vcmp.gt.f32.partialorder %v533_v7, 0.5  ;;  %vm548_vm9 = vcmp.gt.f32.partialorder %v534_v17, 0.5 }
 0x2b1   : > { %v549_v22 = vsel %vm547_vm8, %v2116_v51, -1.0  ;;  %v550_v23 = vsel %vm548_vm9, %v2116_v51, -1.0  ;;  %v514_v44 = vrot.slane %v513_v6, 1  ;;  %1805 = vrcp.f32 %v741_v10 }
 0x2b2   : > { %v536_v26 = vmax.f32 %v533_v7, %v535_v19  ;;  %v542_v27 = vmax.f32 %v534_v17, %v541_v21  ;;  %v551_v5 = vrot.slane %v549_v22, 4  ;;  %v557_v28 = vrot.slane %v550_v23, 4 }
 0x2b3   : > { %v515_v58 = vmin.f32 %v513_v6, %v514_v44 }
 0x2b4   : > { %v537_v32 = vrot.slane %v536_v26, 2  ;;  %v543_v33 = vrot.slane %v542_v27, 2  ;;  %v552_v34 = vmax.f32 %v549_v22, %v551_v5  ;;  %v558_v36 = vmax.f32 %v550_v23, %v557_v28 }
 0x2b5   : > { %v578_v2 = vpop.permute.xlu0 %577  ;;  %v745_v5 = vrot.slane %v2137_v61, %v2036_v15  ;;  %v762_v28 = vrot.slane %v2150_v1, %v2033_v14 }
 0x2b6   : > { %v538_v39 = vmax.f32 %v536_v26, %v537_v32  ;;  %v544_v40 = vmax.f32 %v542_v27, %v543_v33  ;;  %v553_v41 = vrot.slane %v552_v34, 2  ;;  %v559_v42 = vrot.slane %v558_v36, 2 }
 0x2b7   : > { %1807 = vrcp.f32 %v745_v5 }
 0x2b8   : > { %v539_v45 = vrot.slane %v538_v39, 1  ;;  %v545_v46 = vrot.slane %v544_v40, 1  ;;  %v554_v47 = vmax.f32 %v552_v34, %v553_v41  ;;  %v560_v50 = vmax.f32 %v558_v36, %v559_v42  ;;  %v1802_v36 = vpop.eup %1801 }
 0x2b9   : > { %v730_v42 = vrot.slane %v2160_v25, %v2036_v15  ;;  %1809 = vrcp.f32 %v762_v28 }
 0x2ba   : > { %v2128_v53 = vmax.f32 %v538_v39, %v539_v45  ;;  %v2130_v54 = vmax.f32 %v544_v40, %v545_v46  ;;  %v555_v55 = vrot.slane %v554_v47, 1  ;;  %v561_v56 = vrot.slane %v560_v50, 1 }
 0x2bb   : > { %v726_v39 = vrot.slane %v2160_v25, %v2033_v14  ;;  %v941_v25 = vadd.s32 72, %v2030_v13 }
 0x2bc   : > { %v556_v59 = vmax.f32 %v554_v47, %v555_v55  ;;  %v562_v60 = vmax.f32 %v560_v50, %v561_v56  ;;  %vm563_vm10 = vcmp.gt.f32.partialorder %v2128_v53, 0.5  ;;  %vm564_vm11 = vcmp.gt.f32.partialorder %v2130_v54, 0.5 }
 0x2bd   : > { %v2173_v55 = vunpack.c.l.s4 %v1916_v52  ;;  %1811 = vrcp.f32 %v726_v39 }
 0x2be   : > { %v565_v62 = vsel %vm563_vm10, %v556_v59, %v509_v57  ;;  %v566_v63 = vsel %vm564_vm11, %v562_v60, %v515_v58  ;;  %v876_v58 = vmul.f32 0.6931472, %v1802_v36 }
 0x2bf   : > { %vm569_vm12 = vcmp.eq.f32.partialorder %v2116_v51, %v565_v62  ;;  %vm570_vm13 = vcmp.eq.f32.partialorder %v2116_v51, %v566_v63  ;;  %v567_v62 = vsel %vm563_vm10, 1.0, %v2111_v48  ;;  %v568_v63 = vsel %vm564_vm11, 1.0, %v2113_v49 }
 0x2c0   : > { %v1640_v9 = vsel %vm569_vm12, 1.0, %v1915_v8  ;;  %v1641_v0 = vsel %vm570_vm13, 1.0, %v1915_v8  ;;  %vm594_vm14 = vcmp.lt.f32.partialorder %v567_v62, 0.5  ;;  %vm595_vm15 = vcmp.lt.f32.partialorder %v568_v63, 0.5 }
 0x2c1   : > { %v580_v7 = vmul.f32 %v1640_v9, %v578_v2  ;;  %v581_v17 = vmul.f32 %v1641_v0, %v578_v2  ;;  %v604_v19 = vmul.f32 %v1640_v9, %v2038_v16  ;;  %v605_v21 = vmul.f32 %v1641_v0, %v2038_v16 }
 0x2c2   : > { %v618_v22 = vmul.f32 %v1640_v9, %v2060_v29  ;;  %v632_v23 = vmul.f32 %v1640_v9, %v2027_v12  ;;  %v633_v24 = vmul.f32 %v1641_v0, %v2027_v12  ;;  %v766_v12 = vrot.slane %v2150_v1, %v2036_v15 }
 0x2c3   : > { %v582_v26 = vrot.slane %v580_v7, 4  ;;  %v588_v27 = vrot.slane %v581_v17, 4  ;;  %v606_v4 = vrot.slane %v604_v19, 4  ;;  %v612_v6 = vrot.slane %v605_v21, 4 }
 0x2c4   : > { %v634_v16 = vrot.slane %v632_v23, 4  ;;  %v640_v32 = vrot.slane %v633_v24, 4  ;;  %v619_v37 = vmul.f32 %v1641_v0, %v2060_v29  ;;  %v620_v38 = vrot.slane %v618_v22, 4  ;;  %v1804_v29 = vpop.eup %1803 }
 0x2c5   : > { %v583_v33 = vadd.f32 %v582_v26, %v580_v7  ;;  %v589_v34 = vadd.f32 %v588_v27, %v581_v17  ;;  %v607_v43 = vadd.f32 %v606_v4, %v604_v19  ;;  %v613_v44 = vadd.f32 %v612_v6, %v605_v21 }
 0x2c6   : > { %v635_v45 = vadd.f32 %v634_v16, %v632_v23  ;;  %v641_v46 = vadd.f32 %v640_v32, %v633_v24  ;;  %v621_v56 = vadd.f32 %v620_v38, %v618_v22  ;;  %v626_v57 = vrot.slane %v619_v37, 4 }
 0x2c7   : > { %v584_v40 = vrot.slane %v583_v33, 2  ;;  %v590_v41 = vrot.slane %v589_v34, 2  ;;  %v608_v2 = vrot.slane %v607_v43, 2  ;;  %v614_v10 = vrot.slane %v613_v44, 2 }
 0x2c8   : > { %v636_v7 = vrot.slane %v635_v45, 2  ;;  %v642_v17 = vrot.slane %v641_v46, 2  ;;  %v646_v19 = vmul.f32 %v1640_v9, %v2062_v30  ;;  %v647_v21 = vmul.f32 %v1641_v0, %v2062_v30  ;;  %v2184_v30 = vpop.eup %1805 }
 0x2c9   : > { %v585_v47 = vadd.f32 %v584_v40, %v583_v33  ;;  %v591_v50 = vadd.f32 %v590_v41, %v589_v34  ;;  %v878_v22 = vmul.f32 0.6931472, %v1804_v29  ;;  %v915_v23 = vunpack.c.0.s8 %v2173_v55 }
 0x2ca   : > { %v622_v24 = vrot.slane %v621_v56, 2  ;;  %v627_v26 = vadd.f32 %v626_v57, %v619_v37  ;;  %v648_v48 = vrot.slane %v646_v19, 4  ;;  %v654_v53 = vrot.slane %v647_v21, 4  ;;  %v2194_v37 = vpop.eup %1807 }
 0x2cb   : > { %v586_v59 = vrot.slane %v585_v47, 1  ;;  %v592_v60 = vrot.slane %v591_v50, 1  ;;  %v609_v49 = vadd.f32 %v608_v2, %v607_v43  ;;  %v615_v5 = vadd.f32 %v614_v10, %v613_v44 }
 0x2cc   : > { %v637_v28 = vadd.f32 %v636_v7, %v635_v45  ;;  %v643_v4 = vadd.f32 %v642_v17, %v641_v46  ;;  %v649_v6 = vadd.f32 %v648_v48, %v646_v19  ;;  %v655_v16 = vadd.f32 %v654_v53, %v647_v21  ;;  %v2200_v46 = vpop.eup %1809 }
 0x2cd   : > { %v587_v27 = vadd.f32 %v586_v59, %v585_v47  ;;  %v593_v54 = vadd.f32 %v592_v60, %v591_v50  ;;  %v628_v0 = vrot.slane %v627_v26, 2  ;;  %v610_v43 = vrot.slane %v609_v49, 1 }
 0x2ce   : > { %v650_v33 = vrot.slane %v649_v6, 2  ;;  %v656_v38 = vrot.slane %v655_v16, 2  ;;  %v616_v47 = vrot.slane %v615_v5, 1  ;;  %v644_v50 = vrot.slane %v643_v4, 1 }
 0x2cf   : > { %v596_v9 = vsel %vm594_vm14, 0.0, %v587_v27  ;;  %v597_v32 = vsel %vm595_vm15, 0.0, %v593_v54  ;;  %v879_v52 = vadd.f32 %v876_v58, %v2103_v31  ;;  %1813 = vrcp.f32 %v766_v12 }
 0x2d0   : > { %vm598_vm0 = vcmp.gt.f32.partialorder %v596_v9, 0.5  ;;  %vm599_vm1 = vcmp.gt.f32.partialorder %v597_v32, 0.5  ;;  %vm881_vm2 = vcmp.eq.f32.partialorder %v2116_v51, %v596_v9  ;;  %vm882_vm3 = vcmp.eq.f32.partialorder %v2116_v51, %v597_v32 }
 0x2d1   : > { %v2189_v34 = vsel %vm598_vm0, 1.0, %v1915_v8  ;;  %v2192_v36 = vsel %vm599_vm1, 1.0, %v1915_v8  ;;  %v883_v39 = vsel %vm881_vm2, %v2095_v18, 0.0  ;;  %v884_v40 = vsel %vm882_vm3, %v2098_v20, 0.0  ;;  %v2206_v18 = vpop.eup %1811 }
 0x2d2   : > { %v899_v41 = vadd.f32 %v2192_v36, %v2189_v34  ;;  %v638_v51 = vrot.slane %v637_v28, 1  ;;  %v885_v44 = vrot.slane %v883_v39, 4  ;;  %v891_v45 = vrot.slane %v884_v40, 4 }
 0x2d3   : > { %v623_v20 = vadd.f32 %v622_v24, %v621_v56  ;;  %v651_v55 = vadd.f32 %v650_v33, %v649_v6  ;;  %v629_v59 = vadd.f32 %v628_v0, %v627_v26  ;;  %v657_v60 = vadd.f32 %v656_v38, %v655_v16 }
 0x2d4   : > { %900 = vadd.xlane.f32.xlu0 %v899_v41  ;;  %v886_v29 = vadd.f32 %v885_v44, %v883_v39  ;;  %v892_v57 = vadd.f32 %v891_v45, %v884_v40  ;;  %v880_v62 = vadd.f32 %v878_v22, %v2105_v35  ;;  %v2210_v63 = vsub.s32 %v915_v23, %v2030_v13 }
 0x2d5   : > { %v2212_v2 = vadd.f32 %v610_v43, %v609_v49  ;;  %v2214_v31 = vadd.f32 %v638_v51, %v637_v28  ;;  %v2216_v12 = vadd.f32 %v616_v47, %v615_v5  ;;  %v2218_v10 = vadd.f32 %v644_v50, %v643_v4 }
 0x2d6   : > { %v887_v58 = vrot.slane %v886_v29, 2  ;;  %v893_v1 = vrot.slane %v892_v57, 2  ;;  %v933_v56 = vadd.s32 8, %v2030_v13  ;;  %v935_v7 = vadd.s32 24, %v2030_v13 }
 0x2d7   : > { %v624_v17 = vrot.slane %v623_v20, 1  ;;  %v652_v19 = vrot.slane %v651_v55, 1  ;;  %v630_v22 = vrot.slane %v629_v59, 1  ;;  %v658_v23 = vrot.slane %v657_v60, 1 }
 0x2d8   : > { %v888_v35 = vadd.f32 %v887_v58, %v886_v29  ;;  %v894_v21 = vadd.f32 %v893_v1, %v892_v57  ;;  %v934_v24 = vadd.s32 16, %v2030_v13  ;;  %v668_v26 = vsub.f32 %v2214_v31, %v2212_v2 }
 0x2d9   : > { %v937_v27 = vadd.s32 40, %v2030_v13  ;;  %v669_v54 = vsub.f32 %v2218_v10, %v2216_v12  ;;  %vm949_vm5 = vcmp.eq.s32.totalorder %v933_v56, %v2076_v3  ;;  %v936_v49 = vadd.s32 32, %v2030_v13 }
 0x2da   : > { %v889_v48 = vrot.slane %v888_v35, 1  ;;  %v895_v53 = vrot.slane %v894_v21, 1  ;;  %v2233_v5 = vadd.s32 56, %v2030_v13  ;;  %v625_v28 = vadd.f32 %v624_v17, %v623_v20 }
 0x2db   : > { %v653_v4 = vadd.f32 %v652_v19, %v651_v55  ;;  %v631_v9 = vadd.f32 %v630_v22, %v629_v59  ;;  %v659_v32 = vadd.f32 %v658_v23, %v657_v60  ;;  %v2239_v0 = vsel %vm948_vm4, 1.0, %v1915_v8 }
 0x2dc   : > { %v890_v6 = vadd.f32 %v889_v48, %v888_v35  ;;  %v896_v16 = vadd.f32 %v895_v53, %v894_v21  ;;  %vm951_vm6 = vcmp.eq.s32.totalorder %v935_v7, %v2076_v3  ;;  %v2243_v39 = vsel %vm949_vm5, 1.0, %v1915_v8  ;;  %v1814_v43 = vpop.eup %1813 }
 0x2dd   : > { %v749_v40 = vmul.f32 %v2184_v30, %v668_v26  ;;  %vm823_vm7 = vcmp.gt.f32.partialorder %v2192_v36, 0.5  ;;  %vm822_vm8 = vcmp.gt.f32.partialorder %v2189_v34, 0.5  ;;  %vm950_vm9 = vcmp.eq.s32.totalorder %v934_v24, %v2076_v3 }
 0x2de   : > { %v897_v33 = vsub.f32 %v879_v52, %v890_v6  ;;  %v898_v38 = vsub.f32 %v880_v62, %v896_v16  ;;  %v751_v41 = vmul.f32 %v2194_v37, %v669_v54  ;;  %v670_v45 = vsub.f32 %v653_v4, %v625_v28 }
 0x2df   : > { %v671_v52 = vsub.f32 %v659_v32, %v631_v9  ;;  %v2269_v20 = vsel %vm951_vm6, 1.0, %v1915_v8  ;;  %v2272_v55 = vsel %vm950_vm9, 1.0, %v1915_v8  ;;  %vm953_vm10 = vcmp.eq.s32.totalorder %v937_v27, %v2076_v3 }
 0x2e0   : > { %v2252_v51 = vsel %vm823_vm7, 0.0, %v898_v38  ;;  %v2256_v44 = vsel %vm822_vm8, 0.0, %v897_v33  ;;  %v902_v30 = vsel %vm822_vm8, %v897_v33, 0.0  ;;  %1815 = vlog2.f32 %v749_v40 }
 0x2e1   : > { %v912_v47 = vcombine.low %v2256_v44, %v2252_v51  ;;  %v997_v50 = vmul.f32 %v2243_v39, %v2256_v44  ;;  %v996_v37 = vmul.f32 %v2239_v0, %v2256_v44  ;;  %vm952_vm11 = vcmp.eq.s32.totalorder %v936_v49, %v2076_v3 }
 0x2e2   : > { %v938_v57 = vadd.s32 48, %v2030_v13  ;;  %1817 = vlog2.f32 %v751_v41  ;;  %vm930_vm12 = vcmp.lt.s32.totalorder %v363_v11, 256  ;;  %v692_v59 = vmul.f32 0.1, %v2137_v61 }
 0x2e3   : > { %v919_v29 = vrot.slane %v912_v47, %v2210_v63  ;;  %1014 = vadd.xlane.f32.xlu0 %v997_v50  ;;  %1012 = vadd.xlane.f32.xlu1 %v996_v37  ;;  %1819 = vrcp.f32 %v730_v42  ;;  %v770_v60 = vmul.f32 %v2200_v46, %v670_v45  ;;  %v999_v58 = vmul.f32 %v2269_v20, %v2256_v44  ;;  %v1644_v46 = vld [vmem:[%s2736_s4 + $0x1] ss:$4 sm:$0x3] }
 0x2e4   : > { %v998_v1 = vmul.f32 %v2272_v55, %v2256_v44  ;;  %v772_v56 = vmul.f32 %v1814_v43, %v671_v52  ;;  %v2292_v11 = vsel %vm953_vm10, 1.0, %v1915_v8  ;;  %v2295_v61 = vsel %vm952_vm11, 1.0, %v1915_v8 }
 0x2e5   : > { %v926_v62 = vrot.slane %v919_v29, %v2210_v63  ;;  %vm955_vm13 = vcmp.eq.s32.totalorder %v2233_v5, %v2076_v3  ;;  %vm954_vm14 = vcmp.eq.s32.totalorder %v938_v57, %v2076_v3  ;;  %v940_v42 = vadd.s32 64, %v2030_v13  ;;  %v672_v29 = vld [vmem:[%s2736_s4] ss:$4 sm:$0x3] }
 0x2e6   : > { %v664_v63 = vadd.f32 %v653_v4, %v625_v28  ;;  %v665_v7 = vadd.f32 %v659_v32, %v631_v9  ;;  %v697_v17 = vrot.slane %v692_v59, %v2033_v14  ;;  %1821 = vlog2.f32 %v770_v60 }
 0x2e7   : > { %932 = vst.msk [vmem:[#allocation2] sm:$0x3] %vm930_vm12, %v926_v62  ;;  %1018 = vadd.xlane.f32.xlu0 %v999_v58  ;;  %1016 = vadd.xlane.f32.xlu1 %v998_v1  ;;  %v1001_v19 = vmul.f32 %v2292_v11, %v2256_v44  ;;  %v1000_v35 = vmul.f32 %v2295_v61, %v2256_v44  ;;  %1823 = vlog2.f32 %v772_v56  ;;  %v2312_v22 = vsel %vm955_vm13, 1.0, %v1915_v8 }
 0x2e8   : > { %v701_v21 = vrot.slane %v692_v59, %v2036_v15  ;;  %v2315_v23 = vsel %vm954_vm14, 1.0, %v1915_v8  ;;  %v943_v24 = vadd.s32 88, %v2030_v13  ;;  %v712_v26 = vrot.slane %v1644_v46, %v2033_v14 }
 0x2e9   : > { %vm957_vm15 = vcmp.eq.s32.totalorder %v941_v25, %v2076_v3  ;;  %vm956_vm0 = vcmp.eq.s32.totalorder %v940_v42, %v2076_v3  ;;  %v942_v48 = vadd.s32 80, %v2030_v13  ;;  %v903_v53 = vsel %vm823_vm7, %v898_v38, 0.0 }
 0x2ea   : > { %v666_v27 = vmul.f32 0.5, %v664_v63  ;;  %v667_v54 = vmul.f32 0.5, %v665_v7  ;;  %v716_v49 = vrot.slane %v1644_v46, %v2036_v15  ;;  %v2325_v5 = vadd.f32 %v903_v53, %v902_v30 }
 0x2eb   : > { %1022 = vadd.xlane.f32.xlu0 %v1001_v19  ;;  %1020 = vadd.xlane.f32.xlu1 %v1000_v35  ;;  %v1003_v28 = vmul.f32 %v2312_v22, %v2256_v44  ;;  %v1002_v4 = vmul.f32 %v2315_v23, %v2256_v44  ;;  %v945_v6 = vadd.s32 104, %v2030_v13  ;;  %1825 = vrcp.f32 %v697_v17 }
 0x2ec   : > { %v2333_v16 = vsel %vm957_vm15, 1.0, %v1915_v8  ;;  %v2336_v9 = vsel %vm956_vm0, 1.0, %v1915_v8  ;;  %vm959_vm1 = vcmp.eq.s32.totalorder %v943_v24, %v2076_v3  ;;  %v944_v32 = vadd.s32 96, %v2030_v13 }
 0x2ed   : > { %v1816_v33 = vpop.eup %1815  ;;  %vm958_vm2 = vcmp.eq.s32.totalorder %v942_v48, %v2076_v3  ;;  %1827 = vrcp.f32 %v701_v21  ;;  %v719_v40 = vsub.f32 %v666_v27, %v712_v26  ;;  %v720_v41 = vsub.f32 %v667_v54, %v716_v49 }
 0x2ee   : > { %v1005_v45 = vmul.f32 %v2333_v16, %v2256_v44  ;;  %v1004_v30 = vmul.f32 %v2336_v9, %v2256_v44  ;;  %v2346_v47 = vsel %vm959_vm1, 1.0, %v1915_v8  ;;  %v947_v50 = vadd.s32 120, %v2030_v13 }
 0x2ef   : > { %1026 = vadd.xlane.f32.xlu0 %v1003_v28  ;;  %1024 = vadd.xlane.f32.xlu1 %v1002_v4  ;;  %v1818_v38 = vpop.eup %1817  ;;  %v2350_v37 = vsel %vm958_vm2, 1.0, %v1915_v8  ;;  %vm961_vm3 = vcmp.eq.s32.totalorder %v945_v6, %v2076_v3  ;;  %vm960_vm4 = vcmp.eq.s32.totalorder %v944_v32, %v2076_v3  ;;  %v946_v52 = vadd.s32 112, %v2030_v13 }
 0x2f0   : > { %v1820_v43 = vpop.eup %1819  ;;  %v660_v57 = vadd.f32 %v2214_v31, %v2212_v2  ;;  %v661_v59 = vadd.f32 %v2218_v10, %v2216_v12  ;;  %v753_v60 = vmul.f32 0.6931472, %v1816_v33  ;;  %v755_v62 = vmul.f32 0.6931472, %v1818_v38 }
 0x2f1   : > { %v734_v58 = vmul.f32 %v2206_v18, %v719_v40  ;;  %v736_v1 = vmul.f32 %v1820_v43, %v720_v41  ;;  %v1007_v25 = vmul.f32 %v2346_v47, %v2256_v44  ;;  %v1006_v42 = vmul.f32 %v2350_v37, %v2256_v44  ;;  %v779_v43 = vld [vmem:[%s341_s23] sm:$0xff] }
 0x2f2   : > { %vm963_vm5 = vcmp.eq.s32.totalorder %v947_v50, %v2076_v3  ;;  %v683_v2 = vrot.slane %v672_v29, %v2033_v14  ;;  %v2372_v12 = vsel %vm961_vm3, 1.0, %v1915_v8  ;;  %v2377_v18 = vsel %vm960_vm4, 1.0, %v1915_v8 }
 0x2f3   : > { %1030 = vadd.xlane.f32.xlu0 %v1005_v45  ;;  %1028 = vadd.xlane.f32.xlu1 %v1004_v30  ;;  %v1822_v56 = vpop.eup %1821  ;;  %vm962_vm6 = vcmp.eq.s32.totalorder %v946_v52, %v2076_v3  ;;  %v687_v10 = vrot.slane %v672_v29, %v2036_v15  ;;  %v662_v46 = vmul.f32 0.5, %v660_v57  ;;  %v663_v63 = vmul.f32 0.5, %v661_v59 }
 0x2f4   : > { %v1824_v31 = vpop.eup %1823  ;;  %v756_v7 = vmul.f32 5.0, %v753_v60  ;;  %v757_v17 = vmul.f32 5.0, %v755_v62  ;;  %v2382_v19 = vsel %vm963_vm5, 1.0, %v1915_v8  ;;  %v788_v35 = vcombine.low %v734_v58, %v736_v1 }
 0x2f5   : > { %v1009_v21 = vmul.f32 %v2372_v12, %v2256_v44  ;;  %v1008_v24 = vmul.f32 %v2377_v18, %v2256_v44  ;;  %v774_v3 = vmul.f32 0.6931472, %v1822_v56  ;;  %v776_v26 = vmul.f32 0.6931472, %v1824_v31 }
 0x2f6   : > { %v2389_v53 = vsel %vm962_vm6, 1.0, %v1915_v8  ;;  %v690_v27 = vsub.f32 %v662_v46, %v683_v2  ;;  %v691_v54 = vsub.f32 %v663_v63, %v687_v10  ;;  %v800_v49 = vcombine.low %v756_v7, %v757_v17 }
 0x2f7   : > { %1034 = vadd.xlane.f32.xlu0 %v1007_v25  ;;  %1032 = vadd.xlane.f32.xlu1 %v1006_v42  ;;  %v1011_v4 = vmul.f32 %v2382_v19, %v2256_v44  ;;  %v1010_v6 = vmul.f32 %v2389_v53, %v2256_v44  ;;  %v777_v32 = vmul.f32 5.0, %v774_v3  ;;  %v778_v33 = vmul.f32 5.0, %v776_v26 }
 0x2f8   : > { %v1826_v48 = vpop.eup %1825  ;;  %v789_v8 = vrot.slane %v788_v35, 7  ;;  %v801_v41 = vrot.slane %v800_v49, 6  ;;  %v1062_v45 = vmul.f32 %v2243_v39, %v2252_v51  ;;  %v1061_v30 = vmul.f32 %v2239_v0, %v2252_v51 }
 0x2f9   : > { %v705_v38 = vmul.f32 %v1826_v48, %v690_v27  ;;  %v812_v50 = vcombine.low %v777_v32, %v778_v33  ;;  %v1064_v57 = vmul.f32 %v2269_v20, %v2252_v51  ;;  %v1063_v59 = vmul.f32 %v2272_v55, %v2252_v51 }
 0x2fa   : > { %v1828_v28 = vpop.eup %1827  ;;  %v791_v44 = vsub.f32 %v779_v43, %v789_v8  ;;  %v803_v29 = vsub.f32 %v779_v43, %v801_v41  ;;  %v1066_v0 = vmul.f32 %v2292_v11, %v2252_v51  ;;  %v1065_v1 = vmul.f32 %v2295_v61, %v2252_v51 }
 0x2fb   : > { %1038 = vadd.xlane.f32.xlu0 %v1009_v21  ;;  %1036 = vadd.xlane.f32.xlu1 %v1008_v24  ;;  %v707_v40 = vmul.f32 %v1828_v28, %v691_v54  ;;  %v813_v62 = vrot.slane %v812_v50, 5  ;;  %v1068_v55 = vmul.f32 %v2312_v22, %v2252_v51  ;;  %v1067_v2 = vmul.f32 %v2315_v23, %v2252_v51 }
 0x2fc   : > { %v792_v60 = vand.u32 2147483647, %v791_v44  ;;  %v804_v58 = vand.u32 2147483647, %v803_v29  ;;  %v1070_v61 = vmul.f32 %v2333_v16, %v2252_v51  ;;  %v1069_v46 = vmul.f32 %v2336_v9, %v2252_v51 }
 0x2fd   : > { %v782_v52 = vcombine.low %v705_v38, %v707_v40  ;;  %v815_v25 = vsub.f32 %v779_v43, %v813_v62  ;;  %v831_v22 = vsub.s32 4, %v2030_v13  ;;  %v1072_v23 = vmul.f32 %v2346_v47, %v2252_v51 }
 0x2fe   : > { %v1647_v56 = vrot.slane %v792_v60, 9  ;;  %v1648_v42 = vrot.slane %v804_v58, 10  ;;  %v1071_v17 = vmul.f32 %v2350_v37, %v2252_v51  ;;  %v1074_v9 = vmul.f32 %v2372_v12, %v2252_v51 }
 0x2ff   : > { %1042 = vadd.xlane.f32.xlu0 %v1011_v4  ;;  %1040 = vadd.xlane.f32.xlu1 %v1010_v6  ;;  %v784_v39 = vsub.f32 %v779_v43, %v782_v52  ;;  %v816_v10 = vand.u32 2147483647, %v815_v25  ;;  %v1073_v21 = vmul.f32 %v2377_v18, %v2252_v51  ;;  %vm837_vm9 = vcmask 1040384  }
 0x300   : > { %v1076_v37 = vmul.f32 %v2382_v19, %v2252_v51  ;;  %v1075_v24 = vmul.f32 %v2389_v53, %v2252_v51  ;;  %v2484_v25 = vmov 0.0  }
 0x301   : > { %v785_v20 = vand.u32 2147483647, %v784_v39  ;;  %v1649_v63 = vrot.slane %v816_v10, 11 }
 0x303   : > { %1079 = vadd.xlane.f32.xlu0 %v1062_v45  ;;  %1077 = vadd.xlane.f32.xlu1 %v1061_v30  ;;  %v797_v31 = vadd.f32 %v1647_v56, %v785_v20 }
 0x305   : > { %v809_v11 = vadd.f32 %v1648_v42, %v797_v31 }
 0x307   : > { %1083 = vadd.xlane.f32.xlu0 %v1064_v57  ;;  %1081 = vadd.xlane.f32.xlu1 %v1063_v59  ;;  %v821_v7 = vadd.f32 %v1649_v63, %v809_v11 }
 0x309   : > { %v828_v35 = vrot.slane %v821_v7, %v2033_v14  ;;  %v832_v16 = vrot.slane %v821_v7, %v831_v22 }
 0x30b   : > { %1087 = vadd.xlane.f32.xlu0 %v1066_v0  ;;  %1085 = vadd.xlane.f32.xlu1 %v1065_v1  ;;  %v835_v13 = vsel %vm822_vm8, %v828_v35, 0.0  ;;  %v836_v47 = vsel %vm823_vm7, %v832_v16, 0.0  ;;  %vm1044_vm7 = vcmask 7168  }
 0x30c   : > { %v838_v12 = vsel %vm837_vm9, %v835_v13, 0.0  ;;  %v839_v3 = vsel %vm837_vm9, %v836_v47, 0.0 }
 0x30d   : > { %v840_v18 = vadd.f32 %v839_v3, %v838_v12 }
 0x30f   : > { %1091 = vadd.xlane.f32.xlu0 %v1068_v55  ;;  %1089 = vadd.xlane.f32.xlu1 %v1067_v2 }
 0x313   : > { %1095 = vadd.xlane.f32.xlu0 %v1070_v61  ;;  %1093 = vadd.xlane.f32.xlu1 %v1069_v46 }
 0x317   : > { %1099 = vadd.xlane.f32.xlu0 %v1072_v23  ;;  %1097 = vadd.xlane.f32.xlu1 %v1071_v17 }
 0x31b   : > { %1103 = vadd.xlane.f32.xlu0 %v1074_v9  ;;  %1101 = vadd.xlane.f32.xlu1 %v1073_v21 }
 0x31f   : > { %1107 = vadd.xlane.f32.xlu0 %v1076_v37  ;;  %1105 = vadd.xlane.f32.xlu1 %v1075_v24 }
 0x323   : > { %841 = vadd.xlane.f32.xlu1 %v840_v18 }
 0x327   : > { %905 = vadd.xlane.f32.xlu1 %v2325_v5 }
 0x35d   : > { %v2439_v34 = vpop.xlane.xlu0 %900 }
 0x35e   : > { %v2442_v36 = vmul.f32 3.0, %v2439_v34 }
 0x36c   : > { %v1015_v26 = vpop.xlane.xlu0 %1014  ;;  %v1013_v19 = vpop.xlane.xlu1 %1012 }
 0x36d   : > { %1046 = vst.msk [vmem:[#allocation3 + $0x8] sm:$0xff] %vm1044_vm7, %v1015_v26  ;;  %1045 = vst.msk [vmem:[#allocation3] sm:$0xff] %vm1044_vm7, %v1013_v19 }
 0x370   : > { %v1019_v51 = vpop.xlane.xlu0 %1018  ;;  %v1017_v48 = vpop.xlane.xlu1 %1016 }
 0x371   : > { %1048 = vst.msk [vmem:[#allocation3 + $0x18] sm:$0xff] %vm1044_vm7, %v1019_v51  ;;  %1047 = vst.msk [vmem:[#allocation3 + $0x10] sm:$0xff] %vm1044_vm7, %v1017_v48 }
 0x374   : > { %v1023_v5 = vpop.xlane.xlu0 %1022  ;;  %v1021_v53 = vpop.xlane.xlu1 %1020 }
 0x375   : > { %1050 = vst.msk [vmem:[#allocation3 + $0x28] sm:$0xff] %vm1044_vm7, %v1023_v5  ;;  %1049 = vst.msk [vmem:[#allocation3 + $0x20] sm:$0xff] %vm1044_vm7, %v1021_v53 }
 0x378   : > { %v1027_v27 = vpop.xlane.xlu0 %1026  ;;  %v1025_v54 = vpop.xlane.xlu1 %1024 }
 0x379   : > { %1052 = vst.msk [vmem:[#allocation3 + $0x38] sm:$0xff] %vm1044_vm7, %v1027_v27  ;;  %1051 = vst.msk [vmem:[#allocation3 + $0x30] sm:$0xff] %vm1044_vm7, %v1025_v54 }
 0x37c   : > { %v1031_v49 = vpop.xlane.xlu0 %1030  ;;  %v1029_v28 = vpop.xlane.xlu1 %1028 }
 0x37d   : > { %1054 = vst.msk [vmem:[#allocation3 + $0x48] sm:$0xff] %vm1044_vm7, %v1031_v49  ;;  %1053 = vst.msk [vmem:[#allocation3 + $0x40] sm:$0xff] %vm1044_vm7, %v1029_v28 }
 0x380   : > { %v1035_v4 = vpop.xlane.xlu0 %1034  ;;  %v1033_v6 = vpop.xlane.xlu1 %1032 }
 0x381   : > { %1056 = vst.msk [vmem:[#allocation3 + $0x58] sm:$0xff] %vm1044_vm7, %v1035_v4  ;;  %1055 = vst.msk [vmem:[#allocation3 + $0x50] sm:$0xff] %vm1044_vm7, %v1033_v6 }
 0x384   : > { %v1039_v32 = vpop.xlane.xlu0 %1038  ;;  %v1037_v33 = vpop.xlane.xlu1 %1036 }
 0x385   : > { %1058 = vst.msk [vmem:[#allocation3 + $0x68] sm:$0xff] %vm1044_vm7, %v1039_v32  ;;  %1057 = vst.msk [vmem:[#allocation3 + $0x60] sm:$0xff] %vm1044_vm7, %v1037_v33 }
 0x388   : > { %v1043_v8 = vpop.xlane.xlu0 %1042  ;;  %v1041_v38 = vpop.xlane.xlu1 %1040 }
 0x389   : > { %1060 = vst.msk [vmem:[#allocation3 + $0x78] sm:$0xff] %vm1044_vm7, %v1043_v8  ;;  %1059 = vst.msk [vmem:[#allocation3 + $0x70] sm:$0xff] %vm1044_vm7, %v1041_v38 }
 0x38c   : > { %v1080_v40 = vpop.xlane.xlu0 %1079  ;;  %v1078_v41 = vpop.xlane.xlu1 %1077 }
 0x38d   : > { %1110 = vst.msk [vmem:[#allocation3 + $0x88] sm:$0xff] %vm1044_vm7, %v1080_v40  ;;  %1109 = vst.msk [vmem:[#allocation3 + $0x80] sm:$0xff] %vm1044_vm7, %v1078_v41 }
 0x390   : > { %v1084_v43 = vpop.xlane.xlu0 %1083  ;;  %v1082_v45 = vpop.xlane.xlu1 %1081 }
 0x391   : > { %1112 = vst.msk [vmem:[#allocation3 + $0x98] sm:$0xff] %vm1044_vm7, %v1084_v43  ;;  %1111 = vst.msk [vmem:[#allocation3 + $0x90] sm:$0xff] %vm1044_vm7, %v1082_v45 }
 0x394   : > { %v1088_v30 = vpop.xlane.xlu0 %1087  ;;  %v1086_v44 = vpop.xlane.xlu1 %1085 }
 0x395   : > { %1114 = vst.msk [vmem:[#allocation3 + $0xa8] sm:$0xff] %vm1044_vm7, %v1088_v30  ;;  %1113 = vst.msk [vmem:[#allocation3 + $0xa0] sm:$0xff] %vm1044_vm7, %v1086_v44 }
 0x398   : > { %v1092_v50 = vpop.xlane.xlu0 %1091  ;;  %v1090_v52 = vpop.xlane.xlu1 %1089 }
 0x399   : > { %1116 = vst.msk [vmem:[#allocation3 + $0xb8] sm:$0xff] %vm1044_vm7, %v1092_v50  ;;  %1115 = vst.msk [vmem:[#allocation3 + $0xb0] sm:$0xff] %vm1044_vm7, %v1090_v52 }
 0x39c   : > { %v1096_v29 = vpop.xlane.xlu0 %1095  ;;  %v1094_v57 = vpop.xlane.xlu1 %1093 }
 0x39d   : > { %1118 = vst.msk [vmem:[#allocation3 + $0xc8] sm:$0xff] %vm1044_vm7, %v1096_v29  ;;  %1117 = vst.msk [vmem:[#allocation3 + $0xc0] sm:$0xff] %vm1044_vm7, %v1094_v57 }
 0x3a0   : > { %v1100_v59 = vpop.xlane.xlu0 %1099  ;;  %v1098_v60 = vpop.xlane.xlu1 %1097 }
 0x3a1   : > { %1120 = vst.msk [vmem:[#allocation3 + $0xd8] sm:$0xff] %vm1044_vm7, %v1100_v59  ;;  %1119 = vst.msk [vmem:[#allocation3 + $0xd0] sm:$0xff] %vm1044_vm7, %v1098_v60 }
 0x3a4   : > { %v1104_v62 = vpop.xlane.xlu0 %1103  ;;  %v1102_v39 = vpop.xlane.xlu1 %1101 }
 0x3a5   : > { %1122 = vst.msk [vmem:[#allocation3 + $0xe8] sm:$0xff] %vm1044_vm7, %v1104_v62  ;;  %1121 = vst.msk [vmem:[#allocation3 + $0xe0] sm:$0xff] %vm1044_vm7, %v1102_v39 }
 0x3a8   : > { %v1108_v58 = vpop.xlane.xlu0 %1107  ;;  %v1106_v0 = vpop.xlane.xlu1 %1105 }
 0x3a9   : > { %1124 = vst.msk [vmem:[#allocation3 + $0xf8] sm:$0xff] %vm1044_vm7, %v1108_v58  ;;  %1123 = vst.msk [vmem:[#allocation3 + $0xf0] sm:$0xff] %vm1044_vm7, %v1106_v0 }
 0x3ac   : > { %v2476_v1 = vpop.xlane.xlu1 %841 }
 0x3b0   : > { %v2478_v56 = vpop.xlane.xlu1 %905 }
 0x3b1 LB: >> { %v1917_v20 = vmov 0   ;;  %s1666_s13 = sshll.u32 %s1907_s8, 7  ;;  %v1150_v21 = vld [vmem:[#allocation2] sm:$0x3]  ;;  %v1918_v12 = vmov 0.0   ;;  %s1130_s8 = sadd.s32 1, %s1907_s8   ;;  %s1907_s8 = sphi %s2486_s8, %s1130_s8   ;;  %v1903_v25 = vphi %v2484_v25, %v2742_v25  }
 0x3b2   : >> { %1830 = vset.pattern.permute.xlu1 %v1917_v20  ;;  %1829 = vset.pattern.permute.xlu0 %v1917_v20  ;;  %s1133_s9 = scalar_lea.vmem [#allocation3], %s1666_s13  ;;  %v2544_v13 = vrot.slane %v1150_v21, %v2033_v14  ;;  %v2547_v47 = vrot.slane %v1150_v21, %v2036_v15  ;;  %p1127_p11 = scmp.ge.s32.totalorder %s1130_s8, 2  }
 0x3b3   : >> { %v2495_v42 = vld [vmem:[%s1133_s9 + $0x10] sm:$0xff]  ;;  %v2497_v55 = vld [vmem:[%s1133_s9] sm:$0xff]  ;;  %v2501_v2 = vld [vmem:[%s1133_s9 + $0x18] sm:$0xff]  ;;  %s1919_s15 = smov (%p1127_p11), 3   ;;  %s1715_s16 = sshll.u32 (%p1127_p11), %s1982_s28, 4 }
 0x3b4   : >> { %1174 = vperm.xlu1 %1830, %v2495_v42   ;;  %1164 = vperm.xlu0 %1829, %v2497_v55   ;;  %v2503_v31 = vld [vmem:[%s1133_s9 + $0x8] sm:$0xff]  ;;  %v2509_v11 = vld [vmem:[%s1133_s9 + $0x20] sm:$0xff]  ;;  %v2513_v61 = vld [vmem:[%s1133_s9 + $0x38] sm:$0xff]  ;;  %s1513_s17 = sshll.u32 (%p1127_p11), %s2482_s29, 4  ;;  %s2694_s20 = scalar_lea.hbm (%p1127_p11), %s2739_s7, %s1715_s16  ;;  %s1514_s17 = int_to_ptr.vmem [resolvable:$true] %s1513_s17 }
 0x3b5   : >> { %v2507_v10 = vld [vmem:[%s1133_s9 + $0x28] sm:$0xff]  ;;  %v2515_v46 = vld [vmem:[%s1133_s9 + $0x30] sm:$0xff]  ;;  %v2521_v7 = vld [vmem:[%s1133_s9 + $0x40] sm:$0xff]  ;;  %s1501_s21 = scalar_lea.sflag (%p1127_p11), [#allocation5], %s323_s14  ;;  %s1831_s22 = scalar_lea.vmem (%p1127_p11), %s1514_s17, 16 }
 0x3b6   : >> { %v2519_v63 = vld [vmem:[%s1133_s9 + $0x48] sm:$0xff]  ;;  %v2525_v22 = vld [vmem:[%s1133_s9 + $0x58] sm:$0xff]  ;;  %v2527_v23 = vld [vmem:[%s1133_s9 + $0x50] sm:$0xff]  ;;  %p1832_p12 = scmp.ne.s32.totalorder (%p1127_p11), %s1514_s17, %s1831_s22  ;;  %s1920_s23 = smov (%p1127_p11), [#allocation4]  }
 0x3b7   : >> { %v2531_v17 = vld [vmem:[%s1133_s9 + $0x68] sm:$0xff]  ;;  %v2533_v35 = vld [vmem:[%s1133_s9 + $0x60] sm:$0xff]  ;;  %v2537_v16 = vld [vmem:[%s1133_s9 + $0x78] sm:$0xff]  ;;  %s1835_s8 = sshll.u32 (%p1127_p11), %s1920_s23, 4  ;;  %s1836_s8 = int_to_ptr.vmem [resolvable:$false] %s1835_s8 }
 0x3b8   : >> { %1179 = vperm.xlu1 %1830, %v2501_v2   ;;  %1169 = vperm.xlu0 %1829, %v2503_v31   ;;  %v2539_v9 = vld [vmem:[%s1133_s9 + $0x70] sm:$0xff]  ;;  %p1833_p13 = pnand (%p1127_p11), %p1832_p12, %p1999_p5  ;;  %s1837_s28 = scalar_lea.vmem (%p1127_p11), %s1836_s8, 32 }
 0x3b9   : > { %p1838_p1 = scmp.lt.s32.totalorder (%p1127_p11), %s1514_s17, %s1836_s8  ;;  %p1839_p2 = scmp.lt.s32.totalorder (%p1127_p11), %s1837_s28, %s1831_s22 }
 0x3ba   : > { %p1834_p0 = pneg (%p1127_p11), %p1833_p13 }
 0x3bb   : > { %p1840_p3 = por (%p1127_p11), %p1839_p2, %p1838_p1 }
 0x3bc   : >> { %1189 = vperm.xlu1 %1830, %v2507_v10   ;;  %1184 = vperm.xlu0 %1829, %v2509_v11  }
 0x3bd   : > { %p1841_p4 = pnand (%p1127_p11), %p1840_p3, %p1834_p0 }
 0x3c0   : >> { %1199 = vperm.xlu1 %1830, %v2513_v61   ;;  %1194 = vperm.xlu0 %1829, %v2515_v46  }
 0x3c4   : >> { %1209 = vperm.xlu1 %1830, %v2519_v63   ;;  %1204 = vperm.xlu0 %1829, %v2521_v7  }
 0x3c8   : >> { %1219 = vperm.xlu1 %1830, %v2525_v22   ;;  %1214 = vperm.xlu0 %1829, %v2527_v23  }
 0x3cc   : >> { %1229 = vperm.xlu1 %1830, %v2531_v17   ;;  %1224 = vperm.xlu0 %1829, %v2533_v35  }
 0x3d0   : >> { %1239 = vperm.xlu1 %1830, %v2537_v16   ;;  %1234 = vperm.xlu0 %1829, %v2539_v9  }
 0x42f   : >> { %v1175_v37 = vpop.permute.xlu1 %1174  ;;  %v1165_v24 = vpop.permute.xlu0 %1164 }
 0x430   : >> { %vm1246_vm8 = vcmp.gt.f32.partialorder %v2544_v13, %v1175_v37  ;;  %vm1247_vm10 = vcmp.gt.f32.partialorder %v2547_v47, %v1175_v37  ;;  %vm1242_vm11 = vcmp.gt.f32.partialorder %v2544_v13, %v1165_v24  ;;  %vm1243_vm12 = vcmp.gt.f32.partialorder %v2547_v47, %v1165_v24 }
 0x431   : >> { %v1667_v3 = vsel %vm1242_vm11, 1.0, %v1918_v12  ;;  %v1668_v18 = vsel %vm1243_vm12, 1.0, %v1918_v12  ;;  %v1671_v26 = vsel %vm1246_vm8, 1.0, %v1918_v12  ;;  %v1672_v19 = vsel %vm1247_vm10, 1.0, %v1918_v12 }
 0x432   : >> { %v1338_v51 = vadd.f32 %v1668_v18, %v1667_v3  ;;  %v1344_v53 = vadd.f32 %v1672_v19, %v1671_v26 }
 0x433   : >> { %v1180_v48 = vpop.permute.xlu1 %1179  ;;  %v1170_v5 = vpop.permute.xlu0 %1169 }
 0x434   : >> { %vm1248_vm13 = vcmp.gt.f32.partialorder %v2544_v13, %v1180_v48  ;;  %vm1249_vm14 = vcmp.gt.f32.partialorder %v2547_v47, %v1180_v48  ;;  %vm1244_vm15 = vcmp.gt.f32.partialorder %v2544_v13, %v1170_v5  ;;  %vm1245_vm0 = vcmp.gt.f32.partialorder %v2547_v47, %v1170_v5  ;;  %1339 = vadd.xlane.f32.xlu0 %v1338_v51 }
 0x435   : >> { %v1669_v27 = vsel %vm1244_vm15, 1.0, %v1918_v12  ;;  %v1670_v54 = vsel %vm1245_vm0, 1.0, %v1918_v12  ;;  %v1673_v6 = vsel %vm1248_vm13, 1.0, %v1918_v12  ;;  %v1674_v32 = vsel %vm1249_vm14, 1.0, %v1918_v12 }
 0x436   : >> { %v1341_v49 = vadd.f32 %v1670_v54, %v1669_v27  ;;  %v1347_v38 = vadd.f32 %v1674_v32, %v1673_v6 }
 0x437   : >> { %v1190_v28 = vpop.permute.xlu1 %1189  ;;  %v1185_v4 = vpop.permute.xlu0 %1184 }
 0x438   : >> { %vm1252_vm1 = vcmp.gt.f32.partialorder %v2544_v13, %v1190_v28  ;;  %vm1253_vm2 = vcmp.gt.f32.partialorder %v2547_v47, %v1190_v28  ;;  %vm1250_vm3 = vcmp.gt.f32.partialorder %v2544_v13, %v1185_v4  ;;  %vm1251_vm4 = vcmp.gt.f32.partialorder %v2547_v47, %v1185_v4  ;;  %1345 = vadd.xlane.f32.xlu0 %v1344_v53 }
 0x439   : >> { %1342 = vadd.xlane.f32.xlu1 %v1341_v49  ;;  %v1675_v33 = vsel %vm1250_vm3, 1.0, %v1918_v12  ;;  %v1676_v8 = vsel %vm1251_vm4, 1.0, %v1918_v12  ;;  %v1677_v45 = vsel %vm1252_vm1, 1.0, %v1918_v12  ;;  %v1678_v30 = vsel %vm1253_vm2, 1.0, %v1918_v12 }
 0x43a   : >> { %v1350_v40 = vadd.f32 %v1676_v8, %v1675_v33  ;;  %v1353_v52 = vadd.f32 %v1678_v30, %v1677_v45 }
 0x43b   : >> { %v1200_v41 = vpop.permute.xlu1 %1199  ;;  %v1195_v43 = vpop.permute.xlu0 %1194 }
 0x43c   : >> { %vm1256_vm5 = vcmp.gt.f32.partialorder %v2544_v13, %v1200_v41  ;;  %vm1257_vm6 = vcmp.gt.f32.partialorder %v2547_v47, %v1200_v41  ;;  %vm1254_vm9 = vcmp.gt.f32.partialorder %v2544_v13, %v1195_v43  ;;  %vm1255_vm8 = vcmp.gt.f32.partialorder %v2547_v47, %v1195_v43  ;;  %1348 = vadd.xlane.f32.xlu0 %v1347_v38 }
 0x43d   : >> { %1351 = vadd.xlane.f32.xlu1 %v1350_v40  ;;  %v1679_v44 = vsel %vm1254_vm9, 1.0, %v1918_v12  ;;  %v1680_v50 = vsel %vm1255_vm8, 1.0, %v1918_v12  ;;  %v1681_v60 = vsel %vm1256_vm5, 1.0, %v1918_v12  ;;  %v1682_v62 = vsel %vm1257_vm6, 1.0, %v1918_v12 }
 0x43e   : >> { %v1356_v29 = vadd.f32 %v1680_v50, %v1679_v44  ;;  %v1359_v0 = vadd.f32 %v1682_v62, %v1681_v60 }
 0x43f   : >> { %v1210_v57 = vpop.permute.xlu1 %1209  ;;  %v1205_v59 = vpop.permute.xlu0 %1204 }
 0x440   : >> { %vm1260_vm10 = vcmp.gt.f32.partialorder %v2544_v13, %v1210_v57  ;;  %vm1261_vm11 = vcmp.gt.f32.partialorder %v2547_v47, %v1210_v57  ;;  %vm1258_vm12 = vcmp.gt.f32.partialorder %v2544_v13, %v1205_v59  ;;  %vm1259_vm13 = vcmp.gt.f32.partialorder %v2547_v47, %v1205_v59  ;;  %1354 = vadd.xlane.f32.xlu0 %v1353_v52 }
 0x441   : >> { %1357 = vadd.xlane.f32.xlu1 %v1356_v29  ;;  %v1683_v39 = vsel %vm1258_vm12, 1.0, %v1918_v12  ;;  %v1684_v58 = vsel %vm1259_vm13, 1.0, %v1918_v12  ;;  %v1685_v24 = vsel %vm1260_vm10, 1.0, %v1918_v12  ;;  %v1686_v3 = vsel %vm1261_vm11, 1.0, %v1918_v12 }
 0x442   : >> { %v1362_v20 = vadd.f32 %v1684_v58, %v1683_v39  ;;  %v1365_v19 = vadd.f32 %v1686_v3, %v1685_v24 }
 0x443   : >> { %v1220_v21 = vpop.permute.xlu1 %1219  ;;  %v1215_v37 = vpop.permute.xlu0 %1214 }
 0x444   : >> { %vm1264_vm14 = vcmp.gt.f32.partialorder %v2544_v13, %v1220_v21  ;;  %vm1265_vm15 = vcmp.gt.f32.partialorder %v2547_v47, %v1220_v21  ;;  %vm1262_vm0 = vcmp.gt.f32.partialorder %v2544_v13, %v1215_v37  ;;  %vm1263_vm1 = vcmp.gt.f32.partialorder %v2547_v47, %v1215_v37  ;;  %1360 = vadd.xlane.f32.xlu0 %v1359_v0 }
 0x445   : >> { %1363 = vadd.xlane.f32.xlu1 %v1362_v20  ;;  %v1687_v18 = vsel %vm1262_vm0, 1.0, %v1918_v12  ;;  %v1688_v26 = vsel %vm1263_vm1, 1.0, %v1918_v12  ;;  %v1689_v53 = vsel %vm1264_vm14, 1.0, %v1918_v12  ;;  %v1690_v27 = vsel %vm1265_vm15, 1.0, %v1918_v12 }
 0x446   : >> { %v1368_v51 = vadd.f32 %v1688_v26, %v1687_v18  ;;  %v1371_v28 = vadd.f32 %v1690_v27, %v1689_v53 }
 0x447   : >> { %v1230_v48 = vpop.permute.xlu1 %1229  ;;  %v1225_v5 = vpop.permute.xlu0 %1224 }
 0x448   : >> { %vm1268_vm2 = vcmp.gt.f32.partialorder %v2544_v13, %v1230_v48  ;;  %vm1269_vm3 = vcmp.gt.f32.partialorder %v2547_v47, %v1230_v48  ;;  %vm1266_vm4 = vcmp.gt.f32.partialorder %v2544_v13, %v1225_v5  ;;  %vm1267_vm5 = vcmp.gt.f32.partialorder %v2547_v47, %v1225_v5  ;;  %1366 = vadd.xlane.f32.xlu0 %v1365_v19 }
 0x449   : >> { %1369 = vadd.xlane.f32.xlu1 %v1368_v51  ;;  %v1691_v54 = vsel %vm1266_vm4, 1.0, %v1918_v12  ;;  %v1692_v49 = vsel %vm1267_vm5, 1.0, %v1918_v12  ;;  %v1693_v33 = vsel %vm1268_vm2, 1.0, %v1918_v12  ;;  %v1694_v8 = vsel %vm1269_vm3, 1.0, %v1918_v12 }
 0x44a   : >> { %v1374_v4 = vadd.f32 %v1692_v49, %v1691_v54  ;;  %v1377_v41 = vadd.f32 %v1694_v8, %v1693_v33 }
 0x44b   : >> { %v1240_v6 = vpop.permute.xlu1 %1239  ;;  %v1235_v32 = vpop.permute.xlu0 %1234 }
 0x44c   : >> { %vm1272_vm6 = vcmp.gt.f32.partialorder %v2544_v13, %v1240_v6  ;;  %vm1273_vm9 = vcmp.gt.f32.partialorder %v2547_v47, %v1240_v6  ;;  %vm1270_vm8 = vcmp.gt.f32.partialorder %v2544_v13, %v1235_v32  ;;  %vm1271_vm10 = vcmp.gt.f32.partialorder %v2547_v47, %v1235_v32  ;;  %1372 = vadd.xlane.f32.xlu0 %v1371_v28 }
 0x44d   : >> { %1375 = vadd.xlane.f32.xlu1 %v1374_v4  ;;  %v1695_v38 = vsel %vm1270_vm8, 1.0, %v1918_v12  ;;  %v1696_v40 = vsel %vm1271_vm10, 1.0, %v1918_v12  ;;  %v1697_v45 = vsel %vm1272_vm6, 1.0, %v1918_v12  ;;  %v1698_v30 = vsel %vm1273_vm9, 1.0, %v1918_v12 }
 0x44e   : >> { %v1380_v43 = vadd.f32 %v1696_v40, %v1695_v38  ;;  %v1383_v44 = vadd.f32 %v1698_v30, %v1697_v45 }
 0x450   : >> { %1378 = vadd.xlane.f32.xlu0 %v1377_v41 }
 0x451   : >> { %1381 = vadd.xlane.f32.xlu1 %v1380_v43 }
 0x454   : >> { %1384 = vadd.xlane.f32.xlu0 %v1383_v44 }
 0x4bd   : >> { %v1340_v50 = vpop.xlane.xlu0 %1339 }
 0x4be   : >> { %vm1386_vm11 = vcmp.lt.f32.partialorder %v1340_v50, %v2442_v36 }
 0x4bf   : >> { %v1699_v13 = vsel %vm1386_vm11, 1.0, %v1918_v12 }
 0x4c0   : >> { %v1434_v29 = vmul.f32 %v1699_v13, %v2497_v55 }
 0x4c1   : >> { %v1346_v47 = vpop.xlane.xlu0 %1345 }
 0x4c2   : >> { %v1343_v52 = vpop.xlane.xlu1 %1342  ;;  %vm1388_vm12 = vcmp.lt.f32.partialorder %v1346_v47, %v2442_v36  ;;  %v1450_v0 = vsel %vm1044_vm7, %v1434_v29, 0.0 }
 0x4c3   : >> { %vm1387_vm13 = vcmp.lt.f32.partialorder %v1343_v52, %v2442_v36  ;;  %v1701_v57 = vsel %vm1388_vm12, 1.0, %v1918_v12  ;;  %vm1488_vm12 = vcmask (%p1127_p11), 0  }
 0x4c4   : >> { %v1700_v59 = vsel %vm1387_vm13, 1.0, %v1918_v12  ;;  %v1436_v62 = vmul.f32 %v1701_v57, %v2495_v42  ;;  %vm1490_vm13 = vcmask (%p1127_p11), 8200   ;;  %1489 = vst.msk [vmem:[%s2482_s29] sm:$0x1] (%p1127_p11), %vm1488_vm12, %v2439_v34 }
 0x4c5   : >> { %v1435_v60 = vmul.f32 %v1700_v59, %v2503_v31  ;;  %v1349_v39 = vpop.xlane.xlu0 %1348  ;;  %1491 = vst.msk [vmem:[%s2482_s29] sm:$0x1] (%p1127_p11), %vm1490_vm13, %v2476_v1 }
 0x4c6   : >> { %v1352_v58 = vpop.xlane.xlu1 %1351  ;;  %vm1389_vm14 = vcmp.lt.f32.partialorder %v1349_v39, %v2442_v36  ;;  %v1453_v31 = vsel %vm1044_vm7, %v1436_v62, 0.0 }
 0x4c7   : >> { %v1451_v20 = vsel %vm1044_vm7, %v1435_v60, 0.0  ;;  %vm1390_vm15 = vcmp.lt.f32.partialorder %v1352_v58, %v2442_v36  ;;  %v1702_v55 = vsel %vm1389_vm14, 1.0, %v1918_v12  ;;  %vm1492_vm14 = vcmask (%p1127_p11), 16400  }
 0x4c8   : >> { %v1452_v21 = vadd.f32 %v1451_v20, %v1450_v0  ;;  %v1703_v37 = vsel %vm1390_vm15, 1.0, %v1918_v12  ;;  %v1437_v24 = vmul.f32 %v1702_v55, %v2501_v2  ;;  %1493 = vst.msk [vmem:[%s2482_s29] sm:$0x1] (%p1127_p11), %vm1492_vm14, %v2478_v56 }
 0x4c9   : >> { %v1438_v42 = vmul.f32 %v1703_v37, %v2509_v11  ;;  %v1355_v3 = vpop.xlane.xlu0 %1354 }
 0x4ca   : >> { %v1454_v18 = vadd.f32 %v1453_v31, %v1452_v21  ;;  %v1455_v26 = vsel %vm1044_vm7, %v1437_v24, 0.0  ;;  %v1358_v19 = vpop.xlane.xlu1 %1357  ;;  %vm1391_vm0 = vcmp.lt.f32.partialorder %v1355_v3, %v2442_v36 }
 0x4cb   : >> { %vm1392_vm1 = vcmp.lt.f32.partialorder %v1358_v19, %v2442_v36  ;;  %v1704_v51 = vsel %vm1391_vm0, 1.0, %v1918_v12  ;;  %v1457_v53 = vsel %vm1044_vm7, %v1438_v42, 0.0 }
 0x4cc   : >> { %v1456_v48 = vadd.f32 %v1455_v26, %v1454_v18  ;;  %v1705_v5 = vsel %vm1392_vm1, 1.0, %v1918_v12  ;;  %v1439_v2 = vmul.f32 %v1704_v51, %v2507_v10 }
 0x4cd   : >> { %v1440_v11 = vmul.f32 %v1705_v5, %v2515_v46  ;;  %v1361_v27 = vpop.xlane.xlu0 %1360 }
 0x4ce   : >> { %v1458_v54 = vadd.f32 %v1457_v53, %v1456_v48  ;;  %v1459_v49 = vsel %vm1044_vm7, %v1439_v2, 0.0  ;;  %v1364_v28 = vpop.xlane.xlu1 %1363  ;;  %vm1393_vm2 = vcmp.lt.f32.partialorder %v1361_v27, %v2442_v36 }
 0x4cf   : >> { %vm1394_vm3 = vcmp.lt.f32.partialorder %v1364_v28, %v2442_v36  ;;  %v1706_v4 = vsel %vm1393_vm2, 1.0, %v1918_v12  ;;  %v1461_v33 = vsel %vm1044_vm7, %v1440_v11, 0.0 }
 0x4d0   : >> { %v1460_v6 = vadd.f32 %v1459_v49, %v1458_v54  ;;  %v1707_v32 = vsel %vm1394_vm3, 1.0, %v1918_v12  ;;  %v1441_v10 = vmul.f32 %v1706_v4, %v2513_v61 }
 0x4d1   : >> { %v1442_v46 = vmul.f32 %v1707_v32, %v2521_v7  ;;  %v1367_v8 = vpop.xlane.xlu0 %1366 }
 0x4d2   : >> { %v1462_v38 = vadd.f32 %v1461_v33, %v1460_v6  ;;  %v1463_v40 = vsel %vm1044_vm7, %v1441_v10, 0.0  ;;  %v1370_v41 = vpop.xlane.xlu1 %1369  ;;  %vm1395_vm4 = vcmp.lt.f32.partialorder %v1367_v8, %v2442_v36 }
 0x4d3   : >> { %vm1396_vm5 = vcmp.lt.f32.partialorder %v1370_v41, %v2442_v36  ;;  %v1708_v43 = vsel %vm1395_vm4, 1.0, %v1918_v12  ;;  %v1465_v44 = vsel %vm1044_vm7, %v1442_v46, 0.0 }
 0x4d4   : >> { %v1464_v45 = vadd.f32 %v1463_v40, %v1462_v38  ;;  %v1709_v30 = vsel %vm1396_vm5, 1.0, %v1918_v12  ;;  %v1443_v61 = vmul.f32 %v1708_v43, %v2519_v63 }
 0x4d5   : >> { %v1444_v7 = vmul.f32 %v1709_v30, %v2527_v23  ;;  %v1373_v50 = vpop.xlane.xlu0 %1372 }
 0x4d6   : >> { %v1466_v13 = vadd.f32 %v1465_v44, %v1464_v45  ;;  %v1467_v47 = vsel %vm1044_vm7, %v1443_v61, 0.0  ;;  %v1376_v52 = vpop.xlane.xlu1 %1375  ;;  %vm1397_vm6 = vcmp.lt.f32.partialorder %v1373_v50, %v2442_v36 }
 0x4d7   : >> { %vm1398_vm9 = vcmp.lt.f32.partialorder %v1376_v52, %v2442_v36  ;;  %v1710_v29 = vsel %vm1397_vm6, 1.0, %v1918_v12  ;;  %v1469_v60 = vsel %vm1044_vm7, %v1444_v7, 0.0 }
 0x4d8   : >> { %v1468_v57 = vadd.f32 %v1467_v47, %v1466_v13  ;;  %v1711_v59 = vsel %vm1398_vm9, 1.0, %v1918_v12  ;;  %v1445_v63 = vmul.f32 %v1710_v29, %v2525_v22 }
 0x4d9   : >> { %v1446_v23 = vmul.f32 %v1711_v59, %v2533_v35  ;;  %v1379_v62 = vpop.xlane.xlu0 %1378 }
 0x4da   : >> { %v1470_v39 = vadd.f32 %v1469_v60, %v1468_v57  ;;  %v1471_v58 = vsel %vm1044_vm7, %v1445_v63, 0.0  ;;  %v1382_v0 = vpop.xlane.xlu1 %1381  ;;  %vm1399_vm8 = vcmp.lt.f32.partialorder %v1379_v62, %v2442_v36 }
 0x4db   : >> { %vm1400_vm10 = vcmp.lt.f32.partialorder %v1382_v0, %v2442_v36  ;;  %v1712_v20 = vsel %vm1399_vm8, 1.0, %v1918_v12  ;;  %v1473_v37 = vsel %vm1044_vm7, %v1446_v23, 0.0 }
 0x4dc   : >> { %v1472_v55 = vadd.f32 %v1471_v58, %v1470_v39  ;;  %v1713_v21 = vsel %vm1400_vm10, 1.0, %v1918_v12  ;;  %v1447_v22 = vmul.f32 %v1712_v20, %v2531_v17 }
 0x4dd   : >> { %v1448_v35 = vmul.f32 %v1713_v21, %v2539_v9  ;;  %v1385_v24 = vpop.xlane.xlu0 %1384 }
 0x4de   : >> { %v1474_v31 = vadd.f32 %v1473_v37, %v1472_v55  ;;  %v1475_v42 = vsel %vm1044_vm7, %v1447_v22, 0.0  ;;  %vm1401_vm11 = vcmp.lt.f32.partialorder %v1385_v24, %v2442_v36 }
 0x4df   : >> { %v1714_v3 = vsel %vm1401_vm11, 1.0, %v1918_v12  ;;  %v1477_v19 = vsel %vm1044_vm7, %v1448_v35, 0.0 }
 0x4e0   : >> { %v1476_v18 = vadd.f32 %v1475_v42, %v1474_v31  ;;  %v1449_v26 = vmul.f32 %v1714_v3, %v2537_v16 }
 0x4e2   : >> { %v1478_v51 = vadd.f32 %v1477_v19, %v1476_v18  ;;  %v1479_v17 = vsel %vm1044_vm7, %v1449_v26, 0.0  ;;  %vm1498_vm7 = vcmask (%p1127_p11), 24600  }
 0x4e4   : >> { %v1480_v48 = vadd.f32 %v1479_v17, %v1478_v51 }
 0x4e6   : >> { %v1481_v5 = vrot.slane %v1480_v48, 4 }
 0x4e8   : >> { %v1482_v2 = vadd.f32 %v1481_v5, %v1480_v48 }
 0x4ea   : >> { %v1483_v9 = vrot.slane %v1482_v2, 2 }
 0x4ec   : >> { %v1484_v53 = vadd.f32 %v1483_v9, %v1482_v2 }
 0x4ee   : >> { %v1485_v11 = vrot.slane %v1484_v53, 1 }
 0x4f0   : >> { %v1486_v27 = vadd.f32 %v1485_v11, %v1484_v53  ;;  %1129 = sbr.rel (!%p1127_p11) target bundleno = 945 (0x3b1), region = 109 }
 0x4f2   : >> { %v1487_v54 = vadd.f32 %v1903_v25, %v1486_v27  }
 0x4f4   : >> { %v2742_v25 = vmov %v1487_v54  ;;  %1495 = vrot.lane.b32.xlu0 (%p1127_p11), %v1487_v54, %s1919_s15 }
 0x566   : > { %v1496_v14 = vpop.permute.xlu0 %1495 }
 0x567   : > { %1499 = vst.msk [vmem:[%s2482_s29] sm:$0x1] %vm1498_vm7, %v1496_v14 }
 0x568   : > { %1844 = shalt.err (!%p1841_p4)
}
 0x569   : > { %s1845_s29 = scalar_lea.hbm %s2694_s20, 16  ;;  %s1849_s9 = scalar_lea.hbm %s2739_s7, 32 }
 0x56a   : > { %p1846_p7 = scmp.ne.s32.totalorder %s2694_s20, %s1845_s29  ;;  %p1850_p10 = scmp.lt.s32.totalorder %s2694_s20, %s2739_s7 }
 0x56b   : > { %p1851_p11 = scmp.lt.s32.totalorder %s1849_s9, %s1845_s29 }
 0x56c   : > { %p1847_p8 = pnand %p1846_p7, %p1999_p5 }
 0x56d   : > { %p1852_p12 = por %p1851_p11, %p1850_p10 }
 0x56e   : > { %p1848_p9 = pneg %p1847_p8 }
 0x570   : > { %p1853_p13 = pnand %p1852_p12, %p1848_p9 }
 0x572   : > { %1856 = shalt.err (!%p1853_p13)
}
 0x573   : > { %1720 = dma.vmem_to_hbm [thread:$0]  (%p1999_p5), %s1514_s17, 16, %s2694_s20, %s1501_s21  }
 0x574 PF: > { %p1726_p0 = scmp.ge.s32.totalorder %s1899_s27, 2  ;;  %s1525_s18 = sand.u32 1, %s1887_s24  }
 0x575   : > { %s1526_s19 = scalar_lea.sflag [#allocation5], %s1525_s18 }
 0x576   : > { %p1723_p1 = pnand %p1726_p0, %p2003_p6 }
 0x578   : > { %p1724_p2 = pneg %p1723_p1 }
 0x57a   : > { %1882 = dma.done.wait (%p1724_p2), %s1526_s19, 16  }
 0x57b   : > { %1884 = vsyncadd (%p1724_p2), %s1526_s19, 4294967280  ;;  %p17_p3 = scmp.ge.s32.totalorder %s1986_s30, 4   ;;  %s2743_s24 = smov %s1891_s25 }
 0x57c   : > { %s2744_s25 = smov %s1895_s26  ;;  %s2745_s26 = smov %s1997_s10 }
 0x57d   : > { %s2746_s27 = smov %s1986_s30  ;;  %19 = sbr.rel (!%p17_p3) target bundleno = 3 (0x3), region = 120 }
 0x582   :  { %1530 = vsyncpa [#allocation5], 1 }
 0x583   :  { %1532 = vsyncpa [#allocation5 + $0x1], 1 }

</bundles_post_ra>
